<compile_context>
chip_gen: v7x
topology: tpu7x:2x2x1
jax: 0.10.0
libtpu: 0.0.40
codegen_flags: <defaults>
</compile_context>

<pallas_src>
import functools

import jax
import jax.numpy as jnp
from jax.experimental import pallas as pl
from jax.experimental.pallas import tpu as pltpu


# ----------------------------------------------------------------------------
# Model configuration (stand-in dims chosen lane-dense: multiples of 128 where
# the tensor is written to / read from HBM)
# ----------------------------------------------------------------------------
IN_CH = 3          # image channels
C_MID = 32         # conv stem channels (kernel-internal only)
RESNET_DIM = 128   # stand-in for the 2048-d resnet feature (lane-dense)
RNA_DIM = 16       # RNA input features
RNA_HID = 128
RNA_OUT = 128
FIN_HID = 128
N_CLASSES = 4


def _mxu_dot(a, b):
    """bf16 MXU matmul with f32 accumulation."""
    return jnp.dot(a.astype(jnp.bfloat16), b.astype(jnp.bfloat16),
                   preferred_element_type=jnp.float32)


# ----------------------------------------------------------------------------
# Kernel 1: fused image path
#   grid = (batch_tiles, bag_size); bag axis accumulates into VMEM scratch.
#   per step : 3x3 conv (9 shifted-tap matmuls, K=C) + bias + ReLU, spatial sum
#   finalize : scale by 1/(H*W*bag) (GAP + bag mean) and run the projection.
# ----------------------------------------------------------------------------
def _image_path_kernel(x_ref, w9_ref, cb_ref, pw_ref, pb_ref, o_ref, acc_ref,
                       *, H, W, bag_size):
    k = pl.program_id(1)

    @pl.when(k == 0)
    def _init():
        acc_ref[...] = jnp.zeros_like(acc_ref)

    x = x_ref[...]                       # (TILE_B, 1, H+2, W+2, C) f32
    tb = x.shape[0]
    c_in = x.shape[-1]
    cmid = w9_ref.shape[-1]

    # 3x3 conv as 9 accumulated channel-contraction matmuls (no HBM im2col).
    conv = jnp.zeros((tb * H * W, cmid), jnp.float32)
    for t in range(9):
        dy, dx = t // 3, t % 3
        tap = x[:, 0, dy:dy + H, dx:dx + W, :].reshape(tb * H * W, c_in)
        conv = conv + _mxu_dot(tap, w9_ref[t])
    conv = jnp.maximum(conv + cb_ref[...], 0.0)             # bias + ReLU (f32)

    # Spatial sum for this bag member, accumulated across the bag grid axis.
    acc_ref[...] += jnp.sum(conv.reshape(tb, H * W, cmid), axis=1)

    @pl.when(k == pl.num_programs(1) - 1)
    def _finalize():
        scale = 1.0 / float(H * W * bag_size)               # GAP + bag mean
        mean_feat = acc_ref[...] * scale                    # (TILE_B, C_MID)
        feat = _mxu_dot(mean_feat, pw_ref[...]) + pb_ref[...]
        o_ref[...] = feat.astype(o_ref.dtype)               # lane-dense (., 128)


def image_path_pallas(xp, w9, conv_b, proj_w, proj_b):
    """xp: (B, BAG, H+2, W+2, C) padded channels-last patches."""
    B, BAG, Hp, Wp, C = xp.shape
    H, W = Hp - 2, Wp - 2
    cmid = w9.shape[-1]
    rdim = proj_w.shape[-1]

    tile_b = B if B <= 8 else 8
    assert B % tile_b == 0
    nb = B // tile_b

    cb2 = conv_b.reshape(1, cmid)
    pb2 = proj_b.reshape(1, rdim)

    kernel = functools.partial(_image_path_kernel, H=H, W=W, bag_size=BAG)

    flops = int(B * BAG * 9 * 2 * H * W * C * cmid + nb * 2 * tile_b * cmid * rdim)
    bytes_accessed = int(4 * (xp.size + w9.size + cb2.size + proj_w.size
                              + pb2.size + B * rdim))

    return pl.pallas_call(
        kernel,
        out_shape=jax.ShapeDtypeStruct((B, rdim), jnp.float32),
        grid=(nb, BAG),
        in_specs=[
            pl.BlockSpec((tile_b, 1, Hp, Wp, C), lambda i, k: (i, k, 0, 0, 0)),
            pl.BlockSpec((9, C, cmid), lambda i, k: (0, 0, 0)),
            pl.BlockSpec((1, cmid), lambda i, k: (0, 0)),
            pl.BlockSpec((cmid, rdim), lambda i, k: (0, 0)),
            pl.BlockSpec((1, rdim), lambda i, k: (0, 0)),
        ],
        out_specs=pl.BlockSpec((tile_b, rdim), lambda i, k: (i, 0)),
        scratch_shapes=[pltpu.VMEM((tile_b, cmid), jnp.float32)],
        compiler_params=pltpu.CompilerParams(
            dimension_semantics=("parallel", "arbitrary")),
        cost_estimate=pl.CostEstimate(flops=flops, transcendentals=0,
                                      bytes_accessed=bytes_accessed),
    )(xp, w9, cb2, proj_w, pb2)


# ----------------------------------------------------------------------------
# Kernel 2: fused head  (rna_mlp -> concat -> final_mlp), single launch.
#   concat([img, rna_feat]) @ Wf1 == img @ Wf1[:R] + rna_feat @ Wf1[R:]
# ----------------------------------------------------------------------------
def _fusion_head_kernel(img_ref, rna_ref, w1_ref, b1_ref, w2_ref, b2_ref,
                        wf1i_ref, wf1r_ref, bf1_ref, wf2_ref, bf2_ref, o_ref):
    rna_h = jnp.maximum(_mxu_dot(rna_ref[...], w1_ref[...]) + b1_ref[...], 0.0)
    rna_feat = _mxu_dot(rna_h, w2_ref[...]) + b2_ref[...]
    z = (_mxu_dot(img_ref[...], wf1i_ref[...])
         + _mxu_dot(rna_feat, wf1r_ref[...]) + bf1_ref[...])
    z = jnp.maximum(z, 0.0)
    out = _mxu_dot(z, wf2_ref[...]) + bf2_ref[...]
    o_ref[...] = out.astype(o_ref.dtype)


def fusion_head_pallas(img_feat, rna, rna_w1, rna_b1, rna_w2, rna_b2,
                       fin_w1, fin_b1, fin_w2, fin_b2, resnet_dim):
    B, rdim = img_feat.shape
    rna_dim = rna.shape[1]
    rhid = rna_w1.shape[1]
    rout = rna_w2.shape[1]
    fhid = fin_w1.shape[1]
    ncls = fin_w2.shape[1]

    wf1_img = fin_w1[:resnet_dim]                   # (rdim, fhid)
    wf1_rna = fin_w1[resnet_dim:]                   # (rout, fhid)
    b1 = rna_b1.reshape(1, rhid)
    b2 = rna_b2.reshape(1, rout)
    bf1 = fin_b1.reshape(1, fhid)
    bf2 = fin_b2.reshape(1, ncls)

    flops = int(2 * B * (rna_dim * rhid + rhid * rout + rdim * fhid
                         + rout * fhid + fhid * ncls))
    bytes_accessed = int(4 * (img_feat.size + rna.size + rna_w1.size
                              + rna_w2.size + fin_w1.size + fin_w2.size
                              + rhid + rout + fhid + ncls + B * ncls))

    full = lambda shape: pl.BlockSpec(shape, lambda i: (0,) * len(shape))

    return pl.pallas_call(
        _fusion_head_kernel,
        out_shape=jax.ShapeDtypeStruct((B, ncls), jnp.float32),
        grid=(1,),
        in_specs=[
            full((B, rdim)), full((B, rna_dim)),
            full((rna_dim, rhid)), full((1, rhid)),
            full((rhid, rout)), full((1, rout)),
            full((rdim, fhid)), full((rout, fhid)), full((1, fhid)),
            full((fhid, ncls)), full((1, ncls)),
        ],
        out_specs=full((B, ncls)),
        compiler_params=pltpu.CompilerParams(
            dimension_semantics=("arbitrary",)),
        cost_estimate=pl.CostEstimate(flops=flops, transcendentals=0,
                                      bytes_accessed=bytes_accessed),
    )(img_feat, rna, rna_w1, b1, rna_w2, b2, wf1_img, wf1_rna, bf1, fin_w2, bf2)


# ----------------------------------------------------------------------------
# Deterministic parameter init
# ----------------------------------------------------------------------------
def init_params(key):
    ks = jax.random.split(key, 12)

    def w(k, shape, scale=0.05):
        return (scale * jax.random.normal(k, shape)).astype(jnp.float32)

    return {
        # resnet stand-in: conv3x3 (torch layout C_out,C,3,3) + projection
        "conv_w": w(ks[0], (C_MID, IN_CH, 3, 3)),
        "conv_b": w(ks[1], (C_MID,)),
        "proj_w": w(ks[2], (C_MID, RESNET_DIM)),
        "proj_b": w(ks[3], (RESNET_DIM,)),
        # rna_mlp: Linear -> ReLU -> Linear
        "rna_w1": w(ks[4], (RNA_DIM, RNA_HID)),
        "rna_b1": w(ks[5], (RNA_HID,)),
        "rna_w2": w(ks[6], (RNA_HID, RNA_OUT)),
        "rna_b2": w(ks[7], (RNA_OUT,)),
        # final_mlp: Linear -> ReLU -> Linear
        "fin_w1": w(ks[8], (RESNET_DIM + RNA_OUT, FIN_HID)),
        "fin_b1": w(ks[9], (FIN_HID,)),
        "fin_w2": w(ks[10], (FIN_HID, N_CLASSES)),
        "fin_b2": w(ks[11], (N_CLASSES,)),
    }


# ----------------------------------------------------------------------------
# Forward pass (matches BagHistopathologyRNAModel.forward)
# ----------------------------------------------------------------------------
def bag_histopathology_rna_forward(params, patch_bag, rna,
                                   resnet_dim=RESNET_DIM):
    batch_size, bag_size, c, h, w = patch_bag.shape

    # Cheap glue only (no 9x im2col in HBM): spatial pad + channels-last.
    xp = jnp.pad(patch_bag, ((0, 0), (0, 0), (0, 0), (1, 1), (1, 1)))
    xp = jnp.transpose(xp, (0, 1, 3, 4, 2))          # (B, BAG, H+2, W+2, C)

    # Conv weight as 9 per-tap (C_in, C_out) matrices, tap order (dy, dx).
    w9 = jnp.transpose(params["conv_w"], (2, 3, 1, 0)).reshape(9, c, C_MID)

    # Fused: per-patch conv+ReLU+GAP, bag mean, projection -> (B, resnet_dim)
    image_features = image_path_pallas(xp, w9, params["conv_b"],
                                       params["proj_w"], params["proj_b"])

    # Fused: rna_mlp -> concat -> final_mlp -> (B, N_CLASSES)
    output = fusion_head_pallas(image_features, rna,
                                params["rna_w1"], params["rna_b1"],
                                params["rna_w2"], params["rna_b2"],
                                params["fin_w1"], params["fin_b1"],
                                params["fin_w2"], params["fin_b2"],
                                resnet_dim)
    return output


# ----------------------------------------------------------------------------
if __name__ == "__main__":
    key = jax.random.PRNGKey(0)
    k_params, k_bag, k_rna = jax.random.split(key, 3)

    params = init_params(k_params)

    B, BAG, C, H, W = 2, 3, IN_CH, 8, 8
    patch_bag = jax.random.normal(k_bag, (B, BAG, C, H, W), dtype=jnp.float32)
    rna = jax.random.normal(k_rna, (B, RNA_DIM), dtype=jnp.float32)

    fwd = jax.jit(bag_histopathology_rna_forward)
    out = fwd(params, patch_bag, rna)
    out = jax.block_until_ready(out)

    assert out.shape == (B, N_CLASSES)
    assert bool(jnp.all(jnp.isfinite(out)))
    print("KERNEL_OK")
</pallas_src>

<mosaic_0001>
module attributes {stable_mosaic.version = 11 : i64} {
  func.func @_image_path_kernel(%arg0: i32, %arg1: i32, %arg2: memref<2x1x10x10x3xf32, #tpu.memory_space<vmem>>, %arg3: memref<9x3x32xf32, #tpu.memory_space<vmem>>, %arg4: memref<1x32xf32, #tpu.memory_space<vmem>>, %arg5: memref<32x128xf32, #tpu.memory_space<vmem>>, %arg6: memref<1x128xf32, #tpu.memory_space<vmem>>, %arg7: memref<2x128xf32, #tpu.memory_space<vmem>>, %arg8: memref<2x32xf32, #tpu.memory_space<vmem>>) attributes {dimension_semantics = [#tpu.dimension_semantics<parallel>, #tpu.dimension_semantics<arbitrary>], iteration_bounds = array<i64: 1, 3>, scalar_prefetch = 0 : i64, scratch_operands = 1 : i64, tpu.core_type = #tpu.core_type<tc>, window_params = [{transform_indices = @transform_0, window_bounds = array<i64: 2, 1, 10, 10, 3>}, {pipeline_mode = #tpu.pipeline_mode<synchronous>, transform_indices = @transform_1, window_bounds = array<i64: 9, 3, 32>}, {pipeline_mode = #tpu.pipeline_mode<synchronous>, transform_indices = @transform_2, window_bounds = array<i64: 1, 32>}, {pipeline_mode = #tpu.pipeline_mode<synchronous>, transform_indices = @transform_3, window_bounds = array<i64: 32, 128>}, {pipeline_mode = #tpu.pipeline_mode<synchronous>, transform_indices = @transform_4, window_bounds = array<i64: 1, 128>}, {transform_indices = @transform_5, window_bounds = array<i64: 2, 128>}]} {
    %c0_i32 = arith.constant 0 : i32
    %0 = arith.cmpi eq, %arg1, %c0_i32 : i32
    %1 = arith.extui %0 : i1 to i32
    %c0_i32_0 = arith.constant 0 : i32
    %2 = arith.cmpi ne, %1, %c0_i32_0 : i32
    scf.if %2 {
      %cst_42 = arith.constant 0.000000e+00 : f32
      %99 = vector.broadcast %cst_42 : f32 to vector<2x32xf32>
      %c0_43 = arith.constant 0 : index
      %c0_44 = arith.constant 0 : index
      %100 = vector.load %arg8[%c0_43, %c0_44] : memref<2x32xf32, #tpu.memory_space<vmem>>, vector<2x32xf32>
      tpu.vector_store %arg8[%c0_43, %c0_44], %99 {strides = array<i32>} : memref<2x32xf32, #tpu.memory_space<vmem>>, vector<2x32xf32>,
    } else {
    }
    %c0 = arith.constant 0 : index
    %c0_1 = arith.constant 0 : index
    %c0_2 = arith.constant 0 : index
    %c0_3 = arith.constant 0 : index
    %c0_4 = arith.constant 0 : index
    %3 = vector.load %arg2[%c0, %c0_1, %c0_2, %c0_3, %c0_4] : memref<2x1x10x10x3xf32, #tpu.memory_space<vmem>>, vector<2x1x10x10x3xf32>
    %cst = arith.constant 0.000000e+00 : f32
    %4 = vector.broadcast %cst : f32 to vector<128x32xf32>
    %5 = vector.extract_strided_slice %3 {offsets = [0, 0, 0, 0, 0], sizes = [2, 1, 8, 8, 3], strides = [1, 1, 1, 1, 1]} : vector<2x1x10x10x3xf32> to vector<2x1x8x8x3xf32>
    %6 = vector.shape_cast %5 : vector<2x1x8x8x3xf32> to vector<2x8x8x3xf32>
    %7 = vector.shape_cast %6 : vector<2x8x8x3xf32> to vector<128x3xf32>
    %c0_5 = arith.constant 0 : index
    %c0_6 = arith.constant 0 : index
    %c0_7 = arith.constant 0 : index
    %8 = vector.load %arg3[%c0_5, %c0_6, %c0_7] : memref<9x3x32xf32, #tpu.memory_space<vmem>>, vector<1x3x32xf32>
    %9 = vector.shape_cast %8 : vector<1x3x32xf32> to vector<3x32xf32>
    %10 = arith.truncf %7 : vector<128x3xf32> to vector<128x3xbf16>
    %11 = arith.truncf %9 : vector<3x32xf32> to vector<3x32xbf16>
    %cst_8 = arith.constant dense<0.000000e+00> : vector<128x32xf32>
    %12 = tpu.matmul %10, %11, %cst_8 {dimension_numbers = #tpu.dot_dimension_numbers<[1], [0], [0], [1], [0, 0, 1, 1], [], []>} : vector<128x3xbf16>, vector<3x32xbf16>, vector<128x32xf32> -> vector<128x32xf32>
    %13 = arith.addf %4, %12 : vector<128x32xf32>
    %14 = vector.extract_strided_slice %3 {offsets = [0, 0, 0, 1, 0], sizes = [2, 1, 8, 8, 3], strides = [1, 1, 1, 1, 1]} : vector<2x1x10x10x3xf32> to vector<2x1x8x8x3xf32>
    %15 = vector.shape_cast %14 : vector<2x1x8x8x3xf32> to vector<2x8x8x3xf32>
    %16 = vector.shape_cast %15 : vector<2x8x8x3xf32> to vector<128x3xf32>
    %c1 = arith.constant 1 : index
    %c0_9 = arith.constant 0 : index
    %c0_10 = arith.constant 0 : index
    %17 = vector.load %arg3[%c1, %c0_9, %c0_10] : memref<9x3x32xf32, #tpu.memory_space<vmem>>, vector<1x3x32xf32>
    %18 = vector.shape_cast %17 : vector<1x3x32xf32> to vector<3x32xf32>
    %19 = arith.truncf %16 : vector<128x3xf32> to vector<128x3xbf16>
    %20 = arith.truncf %18 : vector<3x32xf32> to vector<3x32xbf16>
    %cst_11 = arith.constant dense<0.000000e+00> : vector<128x32xf32>
    %21 = tpu.matmul %19, %20, %cst_11 {dimension_numbers = #tpu.dot_dimension_numbers<[1], [0], [0], [1], [0, 0, 1, 1], [], []>} : vector<128x3xbf16>, vector<3x32xbf16>, vector<128x32xf32> -> vector<128x32xf32>
    %22 = arith.addf %13, %21 : vector<128x32xf32>
    %23 = vector.extract_strided_slice %3 {offsets = [0, 0, 0, 2, 0], sizes = [2, 1, 8, 8, 3], strides = [1, 1, 1, 1, 1]} : vector<2x1x10x10x3xf32> to vector<2x1x8x8x3xf32>
    %24 = vector.shape_cast %23 : vector<2x1x8x8x3xf32> to vector<2x8x8x3xf32>
    %25 = vector.shape_cast %24 : vector<2x8x8x3xf32> to vector<128x3xf32>
    %c2 = arith.constant 2 : index
    %c0_12 = arith.constant 0 : index
    %c0_13 = arith.constant 0 : index
    %26 = vector.load %arg3[%c2, %c0_12, %c0_13] : memref<9x3x32xf32, #tpu.memory_space<vmem>>, vector<1x3x32xf32>
    %27 = vector.shape_cast %26 : vector<1x3x32xf32> to vector<3x32xf32>
    %28 = arith.truncf %25 : vector<128x3xf32> to vector<128x3xbf16>
    %29 = arith.truncf %27 : vector<3x32xf32> to vector<3x32xbf16>
    %cst_14 = arith.constant dense<0.000000e+00> : vector<128x32xf32>
    %30 = tpu.matmul %28, %29, %cst_14 {dimension_numbers = #tpu.dot_dimension_numbers<[1], [0], [0], [1], [0, 0, 1, 1], [], []>} : vector<128x3xbf16>, vector<3x32xbf16>, vector<128x32xf32> -> vector<128x32xf32>
    %31 = arith.addf %22, %30 : vector<128x32xf32>
    %32 = vector.extract_strided_slice %3 {offsets = [0, 0, 1, 0, 0], sizes = [2, 1, 8, 8, 3], strides = [1, 1, 1, 1, 1]} : vector<2x1x10x10x3xf32> to vector<2x1x8x8x3xf32>
    %33 = vector.shape_cast %32 : vector<2x1x8x8x3xf32> to vector<2x8x8x3xf32>
    %34 = vector.shape_cast %33 : vector<2x8x8x3xf32> to vector<128x3xf32>
    %c3 = arith.constant 3 : index
    %c0_15 = arith.constant 0 : index
    %c0_16 = arith.constant 0 : index
    %35 = vector.load %arg3[%c3, %c0_15, %c0_16] : memref<9x3x32xf32, #tpu.memory_space<vmem>>, vector<1x3x32xf32>
    %36 = vector.shape_cast %35 : vector<1x3x32xf32> to vector<3x32xf32>
    %37 = arith.truncf %34 : vector<128x3xf32> to vector<128x3xbf16>
    %38 = arith.truncf %36 : vector<3x32xf32> to vector<3x32xbf16>
    %cst_17 = arith.constant dense<0.000000e+00> : vector<128x32xf32>
    %39 = tpu.matmul %37, %38, %cst_17 {dimension_numbers = #tpu.dot_dimension_numbers<[1], [0], [0], [1], [0, 0, 1, 1], [], []>} : vector<128x3xbf16>, vector<3x32xbf16>, vector<128x32xf32> -> vector<128x32xf32>
    %40 = arith.addf %31, %39 : vector<128x32xf32>
    %41 = vector.extract_strided_slice %3 {offsets = [0, 0, 1, 1, 0], sizes = [2, 1, 8, 8, 3], strides = [1, 1, 1, 1, 1]} : vector<2x1x10x10x3xf32> to vector<2x1x8x8x3xf32>
    %42 = vector.shape_cast %41 : vector<2x1x8x8x3xf32> to vector<2x8x8x3xf32>
    %43 = vector.shape_cast %42 : vector<2x8x8x3xf32> to vector<128x3xf32>
    %c4 = arith.constant 4 : index
    %c0_18 = arith.constant 0 : index
    %c0_19 = arith.constant 0 : index
    %44 = vector.load %arg3[%c4, %c0_18, %c0_19] : memref<9x3x32xf32, #tpu.memory_space<vmem>>, vector<1x3x32xf32>
    %45 = vector.shape_cast %44 : vector<1x3x32xf32> to vector<3x32xf32>
    %46 = arith.truncf %43 : vector<128x3xf32> to vector<128x3xbf16>
    %47 = arith.truncf %45 : vector<3x32xf32> to vector<3x32xbf16>
    %cst_20 = arith.constant dense<0.000000e+00> : vector<128x32xf32>
    %48 = tpu.matmul %46, %47, %cst_20 {dimension_numbers = #tpu.dot_dimension_numbers<[1], [0], [0], [1], [0, 0, 1, 1], [], []>} : vector<128x3xbf16>, vector<3x32xbf16>, vector<128x32xf32> -> vector<128x32xf32>
    %49 = arith.addf %40, %48 : vector<128x32xf32>
    %50 = vector.extract_strided_slice %3 {offsets = [0, 0, 1, 2, 0], sizes = [2, 1, 8, 8, 3], strides = [1, 1, 1, 1, 1]} : vector<2x1x10x10x3xf32> to vector<2x1x8x8x3xf32>
    %51 = vector.shape_cast %50 : vector<2x1x8x8x3xf32> to vector<2x8x8x3xf32>
    %52 = vector.shape_cast %51 : vector<2x8x8x3xf32> to vector<128x3xf32>
    %c5 = arith.constant 5 : index
    %c0_21 = arith.constant 0 : index
    %c0_22 = arith.constant 0 : index
    %53 = vector.load %arg3[%c5, %c0_21, %c0_22] : memref<9x3x32xf32, #tpu.memory_space<vmem>>, vector<1x3x32xf32>
    %54 = vector.shape_cast %53 : vector<1x3x32xf32> to vector<3x32xf32>
    %55 = arith.truncf %52 : vector<128x3xf32> to vector<128x3xbf16>
    %56 = arith.truncf %54 : vector<3x32xf32> to vector<3x32xbf16>
    %cst_23 = arith.constant dense<0.000000e+00> : vector<128x32xf32>
    %57 = tpu.matmul %55, %56, %cst_23 {dimension_numbers = #tpu.dot_dimension_numbers<[1], [0], [0], [1], [0, 0, 1, 1], [], []>} : vector<128x3xbf16>, vector<3x32xbf16>, vector<128x32xf32> -> vector<128x32xf32>
    %58 = arith.addf %49, %57 : vector<128x32xf32>
    %59 = vector.extract_strided_slice %3 {offsets = [0, 0, 2, 0, 0], sizes = [2, 1, 8, 8, 3], strides = [1, 1, 1, 1, 1]} : vector<2x1x10x10x3xf32> to vector<2x1x8x8x3xf32>
    %60 = vector.shape_cast %59 : vector<2x1x8x8x3xf32> to vector<2x8x8x3xf32>
    %61 = vector.shape_cast %60 : vector<2x8x8x3xf32> to vector<128x3xf32>
    %c6 = arith.constant 6 : index
    %c0_24 = arith.constant 0 : index
    %c0_25 = arith.constant 0 : index
    %62 = vector.load %arg3[%c6, %c0_24, %c0_25] : memref<9x3x32xf32, #tpu.memory_space<vmem>>, vector<1x3x32xf32>
    %63 = vector.shape_cast %62 : vector<1x3x32xf32> to vector<3x32xf32>
    %64 = arith.truncf %61 : vector<128x3xf32> to vector<128x3xbf16>
    %65 = arith.truncf %63 : vector<3x32xf32> to vector<3x32xbf16>
    %cst_26 = arith.constant dense<0.000000e+00> : vector<128x32xf32>
    %66 = tpu.matmul %64, %65, %cst_26 {dimension_numbers = #tpu.dot_dimension_numbers<[1], [0], [0], [1], [0, 0, 1, 1], [], []>} : vector<128x3xbf16>, vector<3x32xbf16>, vector<128x32xf32> -> vector<128x32xf32>
    %67 = arith.addf %58, %66 : vector<128x32xf32>
    %68 = vector.extract_strided_slice %3 {offsets = [0, 0, 2, 1, 0], sizes = [2, 1, 8, 8, 3], strides = [1, 1, 1, 1, 1]} : vector<2x1x10x10x3xf32> to vector<2x1x8x8x3xf32>
    %69 = vector.shape_cast %68 : vector<2x1x8x8x3xf32> to vector<2x8x8x3xf32>
    %70 = vector.shape_cast %69 : vector<2x8x8x3xf32> to vector<128x3xf32>
    %c7 = arith.constant 7 : index
    %c0_27 = arith.constant 0 : index
    %c0_28 = arith.constant 0 : index
    %71 = vector.load %arg3[%c7, %c0_27, %c0_28] : memref<9x3x32xf32, #tpu.memory_space<vmem>>, vector<1x3x32xf32>
    %72 = vector.shape_cast %71 : vector<1x3x32xf32> to vector<3x32xf32>
    %73 = arith.truncf %70 : vector<128x3xf32> to vector<128x3xbf16>
    %74 = arith.truncf %72 : vector<3x32xf32> to vector<3x32xbf16>
    %cst_29 = arith.constant dense<0.000000e+00> : vector<128x32xf32>
    %75 = tpu.matmul %73, %74, %cst_29 {dimension_numbers = #tpu.dot_dimension_numbers<[1], [0], [0], [1], [0, 0, 1, 1], [], []>} : vector<128x3xbf16>, vector<3x32xbf16>, vector<128x32xf32> -> vector<128x32xf32>
    %76 = arith.addf %67, %75 : vector<128x32xf32>
    %77 = vector.extract_strided_slice %3 {offsets = [0, 0, 2, 2, 0], sizes = [2, 1, 8, 8, 3], strides = [1, 1, 1, 1, 1]} : vector<2x1x10x10x3xf32> to vector<2x1x8x8x3xf32>
    %78 = vector.shape_cast %77 : vector<2x1x8x8x3xf32> to vector<2x8x8x3xf32>
    %79 = vector.shape_cast %78 : vector<2x8x8x3xf32> to vector<128x3xf32>
    %c8 = arith.constant 8 : index
    %c0_30 = arith.constant 0 : index
    %c0_31 = arith.constant 0 : index
    %80 = vector.load %arg3[%c8, %c0_30, %c0_31] : memref<9x3x32xf32, #tpu.memory_space<vmem>>, vector<1x3x32xf32>
    %81 = vector.shape_cast %80 : vector<1x3x32xf32> to vector<3x32xf32>
    %82 = arith.truncf %79 : vector<128x3xf32> to vector<128x3xbf16>
    %83 = arith.truncf %81 : vector<3x32xf32> to vector<3x32xbf16>
    %cst_32 = arith.constant dense<0.000000e+00> : vector<128x32xf32>
    %84 = tpu.matmul %82, %83, %cst_32 {dimension_numbers = #tpu.dot_dimension_numbers<[1], [0], [0], [1], [0, 0, 1, 1], [], []>} : vector<128x3xbf16>, vector<3x32xbf16>, vector<128x32xf32> -> vector<128x32xf32>
    %85 = arith.addf %76, %84 : vector<128x32xf32>
    %c0_33 = arith.constant 0 : index
    %c0_34 = arith.constant 0 : index
    %86 = vector.load %arg4[%c0_33, %c0_34] : memref<1x32xf32, #tpu.memory_space<vmem>>, vector<1x32xf32>
    %87 = vector.broadcast %86 : vector<1x32xf32> to vector<128x32xf32>
    %88 = arith.addf %85, %87 : vector<128x32xf32>
    %cst_35 = arith.constant 0.000000e+00 : f32
    %89 = vector.broadcast %cst_35 : f32 to vector<128x32xf32>
    %90 = arith.maximumf %88, %89 : vector<128x32xf32>
    %c0_36 = arith.constant 0 : index
    %c0_37 = arith.constant 0 : index
    %91 = vector.load %arg8[%c0_36, %c0_37] : memref<2x32xf32, #tpu.memory_space<vmem>>, vector<2x32xf32>
    %92 = vector.shape_cast %90 : vector<128x32xf32> to vector<2x64x32xf32>
    %cst_38 = arith.constant dense<0.000000e+00> : vector<2x32xf32>
    %93 = vector.multi_reduction <add>, %92, %cst_38 [1] : vector<2x64x32xf32> to vector<2x32xf32>
    %94 = arith.addf %91, %93 : vector<2x32xf32>
    %c0_39 = arith.constant 0 : index
    %c0_40 = arith.constant 0 : index
    %95 = vector.load %arg8[%c0_39, %c0_40] : memref<2x32xf32, #tpu.memory_space<vmem>>, vector<2x32xf32>
    tpu.vector_store %arg8[%c0_39, %c0_40], %94 {strides = array<i32>} : memref<2x32xf32, #tpu.memory_space<vmem>>, vector<2x32xf32>,
    %c2_i32 = arith.constant 2 : i32
    %96 = arith.cmpi eq, %arg1, %c2_i32 : i32
    %97 = arith.extui %96 : i1 to i32
    %c0_i32_41 = arith.constant 0 : i32
    %98 = arith.cmpi ne, %97, %c0_i32_41 : i32
    scf.if %98 {
      %c0_42 = arith.constant 0 : index
      %c0_43 = arith.constant 0 : index
      %99 = vector.load %arg8[%c0_42, %c0_43] : memref<2x32xf32, #tpu.memory_space<vmem>>, vector<2x32xf32>
      %cst_44 = arith.constant 0.00520833349 : f32
      %100 = vector.broadcast %cst_44 : f32 to vector<2x32xf32>
      %101 = arith.mulf %99, %100 : vector<2x32xf32>
      %c0_45 = arith.constant 0 : index
      %c0_46 = arith.constant 0 : index
      %102 = vector.load %arg5[%c0_45, %c0_46] : memref<32x128xf32, #tpu.memory_space<vmem>>, vector<32x128xf32>
      %103 = arith.truncf %101 : vector<2x32xf32> to vector<2x32xbf16>
      %104 = arith.truncf %102 : vector<32x128xf32> to vector<32x128xbf16>
      %cst_47 = arith.constant dense<0.000000e+00> : vector<2x128xf32>
      %105 = tpu.matmul %103, %104, %cst_47 {dimension_numbers = #tpu.dot_dimension_numbers<[1], [0], [0], [1], [0, 0, 1, 1], [], []>} : vector<2x32xbf16>, vector<32x128xbf16>, vector<2x128xf32> -> vector<2x128xf32>
      %c0_48 = arith.constant 0 : index
      %c0_49 = arith.constant 0 : index
      %106 = vector.load %arg6[%c0_48, %c0_49] : memref<1x128xf32, #tpu.memory_space<vmem>>, vector<1x128xf32>
      %107 = vector.broadcast %106 : vector<1x128xf32> to vector<2x128xf32>
      %108 = arith.addf %105, %107 : vector<2x128xf32>
      %c0_50 = arith.constant 0 : index
      %c0_51 = arith.constant 0 : index
      %109 = vector.load %arg7[%c0_50, %c0_51] : memref<2x128xf32, #tpu.memory_space<vmem>>, vector<2x128xf32>
      tpu.vector_store %arg7[%c0_50, %c0_51], %108 {strides = array<i32>} : memref<2x128xf32, #tpu.memory_space<vmem>>, vector<2x128xf32>,
    } else {
    }
    return
  }
  func.func @transform_0(%arg0: i32, %arg1: i32) -> (i32, i32, i32, i32, i32) {
    %c0_i32 = arith.constant 0 : i32
    %c0_i32_0 = arith.constant 0 : i32
    %c0_i32_1 = arith.constant 0 : i32
    %c0_i32_2 = arith.constant 0 : i32
    return %arg0, %arg1, %c0_i32, %c0_i32_0, %c0_i32_1 : i32, i32, i32, i32, i32
  }
  func.func @transform_1(%arg0: i32, %arg1: i32) -> (i32, i32, i32) {
    %c0_i32 = arith.constant 0 : i32
    %c0_i32_0 = arith.constant 0 : i32
    %c0_i32_1 = arith.constant 0 : i32
    %c0_i32_2 = arith.constant 0 : i32
    return %c0_i32, %c0_i32_0, %c0_i32_1 : i32, i32, i32
  }
  func.func @transform_2(%arg0: i32, %arg1: i32) -> (i32, i32) {
    %c0_i32 = arith.constant 0 : i32
    %c0_i32_0 = arith.constant 0 : i32
    %c0_i32_1 = arith.constant 0 : i32
    return %c0_i32, %c0_i32_0 : i32, i32
  }
  func.func @transform_3(%arg0: i32, %arg1: i32) -> (i32, i32) {
    %c0_i32 = arith.constant 0 : i32
    %c0_i32_0 = arith.constant 0 : i32
    %c0_i32_1 = arith.constant 0 : i32
    return %c0_i32, %c0_i32_0 : i32, i32
  }
  func.func @transform_4(%arg0: i32, %arg1: i32) -> (i32, i32) {
    %c0_i32 = arith.constant 0 : i32
    %c0_i32_0 = arith.constant 0 : i32
    %c0_i32_1 = arith.constant 0 : i32
    return %c0_i32, %c0_i32_0 : i32, i32
  }
  func.func @transform_5(%arg0: i32, %arg1: i32) -> (i32, i32) {
    %c0_i32 = arith.constant 0 : i32
    %c0_i32_0 = arith.constant 0 : i32
    return %arg0, %c0_i32 : i32, i32
  }
}

module attributes {stable_mosaic.version = 11 : i64} {
  func.func @_fusion_head_kernel(%arg0: i32, %arg1: memref<2x128xf32, #tpu.memory_space<vmem>>, %arg2: memref<2x16xf32, #tpu.memory_space<vmem>>, %arg3: memref<16x128xf32, #tpu.memory_space<vmem>>, %arg4: memref<1x128xf32, #tpu.memory_space<vmem>>, %arg5: memref<128x128xf32, #tpu.memory_space<vmem>>, %arg6: memref<1x128xf32, #tpu.memory_space<vmem>>, %arg7: memref<128x128xf32, #tpu.memory_space<vmem>>, %arg8: memref<128x128xf32, #tpu.memory_space<vmem>>, %arg9: memref<1x128xf32, #tpu.memory_space<vmem>>, %arg10: memref<128x4xf32, #tpu.memory_space<vmem>>, %arg11: memref<1x4xf32, #tpu.memory_space<vmem>>, %arg12: memref<2x4xf32, #tpu.memory_space<vmem>>) attributes {dimension_semantics = [#tpu.dimension_semantics<arbitrary>], iteration_bounds = array<i64: 1>, scalar_prefetch = 0 : i64, scratch_operands = 0 : i64, tpu.core_type = #tpu.core_type<tc>, window_params = [{pipeline_mode = #tpu.pipeline_mode<synchronous>, transform_indices = @transform_0, window_bounds = array<i64: 2, 128>}, {pipeline_mode = #tpu.pipeline_mode<synchronous>, transform_indices = @transform_1, window_bounds = array<i64: 2, 16>}, {pipeline_mode = #tpu.pipeline_mode<synchronous>, transform_indices = @transform_2, window_bounds = array<i64: 16, 128>}, {pipeline_mode = #tpu.pipeline_mode<synchronous>, transform_indices = @transform_3, window_bounds = array<i64: 1, 128>}, {pipeline_mode = #tpu.pipeline_mode<synchronous>, transform_indices = @transform_4, window_bounds = array<i64: 128, 128>}, {pipeline_mode = #tpu.pipeline_mode<synchronous>, transform_indices = @transform_5, window_bounds = array<i64: 1, 128>}, {pipeline_mode = #tpu.pipeline_mode<synchronous>, transform_indices = @transform_6, window_bounds = array<i64: 128, 128>}, {pipeline_mode = #tpu.pipeline_mode<synchronous>, transform_indices = @transform_7, window_bounds = array<i64: 128, 128>}, {pipeline_mode = #tpu.pipeline_mode<synchronous>, transform_indices = @transform_8, window_bounds = array<i64: 1, 128>}, {pipeline_mode = #tpu.pipeline_mode<synchronous>, transform_indices = @transform_9, window_bounds = array<i64: 128, 4>}, {pipeline_mode = #tpu.pipeline_mode<synchronous>, transform_indices = @transform_10, window_bounds = array<i64: 1, 4>}, {pipeline_mode = #tpu.pipeline_mode<synchronous>, transform_indices = @transform_11, window_bounds = array<i64: 2, 4>}]} {
    %c0 = arith.constant 0 : index
    %c0_0 = arith.constant 0 : index
    %0 = vector.load %arg2[%c0, %c0_0] : memref<2x16xf32, #tpu.memory_space<vmem>>, vector<2x16xf32>
    %c0_1 = arith.constant 0 : index
    %c0_2 = arith.constant 0 : index
    %1 = vector.load %arg3[%c0_1, %c0_2] : memref<16x128xf32, #tpu.memory_space<vmem>>, vector<16x128xf32>
    %2 = arith.truncf %0 : vector<2x16xf32> to vector<2x16xbf16>
    %3 = arith.truncf %1 : vector<16x128xf32> to vector<16x128xbf16>
    %cst = arith.constant dense<0.000000e+00> : vector<2x128xf32>
    %4 = tpu.matmul %2, %3, %cst {dimension_numbers = #tpu.dot_dimension_numbers<[1], [0], [0], [1], [0, 0, 1, 1], [], []>} : vector<2x16xbf16>, vector<16x128xbf16>, vector<2x128xf32> -> vector<2x128xf32>
    %c0_3 = arith.constant 0 : index
    %c0_4 = arith.constant 0 : index
    %5 = vector.load %arg4[%c0_3, %c0_4] : memref<1x128xf32, #tpu.memory_space<vmem>>, vector<1x128xf32>
    %6 = vector.broadcast %5 : vector<1x128xf32> to vector<2x128xf32>
    %7 = arith.addf %4, %6 : vector<2x128xf32>
    %cst_5 = arith.constant 0.000000e+00 : f32
    %8 = vector.broadcast %cst_5 : f32 to vector<2x128xf32>
    %9 = arith.maximumf %7, %8 : vector<2x128xf32>
    %c0_6 = arith.constant 0 : index
    %c0_7 = arith.constant 0 : index
    %10 = vector.load %arg5[%c0_6, %c0_7] : memref<128x128xf32, #tpu.memory_space<vmem>>, vector<128x128xf32>
    %11 = arith.truncf %9 : vector<2x128xf32> to vector<2x128xbf16>
    %12 = arith.truncf %10 : vector<128x128xf32> to vector<128x128xbf16>
    %cst_8 = arith.constant dense<0.000000e+00> : vector<2x128xf32>
    %13 = tpu.matmul %11, %12, %cst_8 {dimension_numbers = #tpu.dot_dimension_numbers<[1], [0], [0], [1], [0, 0, 1, 1], [], []>} : vector<2x128xbf16>, vector<128x128xbf16>, vector<2x128xf32> -> vector<2x128xf32>
    %c0_9 = arith.constant 0 : index
    %c0_10 = arith.constant 0 : index
    %14 = vector.load %arg6[%c0_9, %c0_10] : memref<1x128xf32, #tpu.memory_space<vmem>>, vector<1x128xf32>
    %15 = vector.broadcast %14 : vector<1x128xf32> to vector<2x128xf32>
    %16 = arith.addf %13, %15 : vector<2x128xf32>
    %c0_11 = arith.constant 0 : index
    %c0_12 = arith.constant 0 : index
    %17 = vector.load %arg1[%c0_11, %c0_12] : memref<2x128xf32, #tpu.memory_space<vmem>>, vector<2x128xf32>
    %c0_13 = arith.constant 0 : index
    %c0_14 = arith.constant 0 : index
    %18 = vector.load %arg7[%c0_13, %c0_14] : memref<128x128xf32, #tpu.memory_space<vmem>>, vector<128x128xf32>
    %19 = arith.truncf %17 : vector<2x128xf32> to vector<2x128xbf16>
    %20 = arith.truncf %18 : vector<128x128xf32> to vector<128x128xbf16>
    %cst_15 = arith.constant dense<0.000000e+00> : vector<2x128xf32>
    %21 = tpu.matmul %19, %20, %cst_15 {dimension_numbers = #tpu.dot_dimension_numbers<[1], [0], [0], [1], [0, 0, 1, 1], [], []>} : vector<2x128xbf16>, vector<128x128xbf16>, vector<2x128xf32> -> vector<2x128xf32>
    %c0_16 = arith.constant 0 : index
    %c0_17 = arith.constant 0 : index
    %22 = vector.load %arg8[%c0_16, %c0_17] : memref<128x128xf32, #tpu.memory_space<vmem>>, vector<128x128xf32>
    %23 = arith.truncf %16 : vector<2x128xf32> to vector<2x128xbf16>
    %24 = arith.truncf %22 : vector<128x128xf32> to vector<128x128xbf16>
    %cst_18 = arith.constant dense<0.000000e+00> : vector<2x128xf32>
    %25 = tpu.matmul %23, %24, %cst_18 {dimension_numbers = #tpu.dot_dimension_numbers<[1], [0], [0], [1], [0, 0, 1, 1], [], []>} : vector<2x128xbf16>, vector<128x128xbf16>, vector<2x128xf32> -> vector<2x128xf32>
    %26 = arith.addf %21, %25 : vector<2x128xf32>
    %c0_19 = arith.constant 0 : index
    %c0_20 = arith.constant 0 : index
    %27 = vector.load %arg9[%c0_19, %c0_20] : memref<1x128xf32, #tpu.memory_space<vmem>>, vector<1x128xf32>
    %28 = vector.broadcast %27 : vector<1x128xf32> to vector<2x128xf32>
    %29 = arith.addf %26, %28 : vector<2x128xf32>
    %cst_21 = arith.constant 0.000000e+00 : f32
    %30 = vector.broadcast %cst_21 : f32 to vector<2x128xf32>
    %31 = arith.maximumf %29, %30 : vector<2x128xf32>
    %c0_22 = arith.constant 0 : index
    %c0_23 = arith.constant 0 : index
    %32 = vector.load %arg10[%c0_22, %c0_23] : memref<128x4xf32, #tpu.memory_space<vmem>>, vector<128x4xf32>
    %33 = arith.truncf %31 : vector<2x128xf32> to vector<2x128xbf16>
    %34 = arith.truncf %32 : vector<128x4xf32> to vector<128x4xbf16>
    %cst_24 = arith.constant dense<0.000000e+00> : vector<2x4xf32>
    %35 = tpu.matmul %33, %34, %cst_24 {dimension_numbers = #tpu.dot_dimension_numbers<[1], [0], [0], [1], [0, 0, 1, 1], [], []>} : vector<2x128xbf16>, vector<128x4xbf16>, vector<2x4xf32> -> vector<2x4xf32>
    %c0_25 = arith.constant 0 : index
    %c0_26 = arith.constant 0 : index
    %36 = vector.load %arg11[%c0_25, %c0_26] : memref<1x4xf32, #tpu.memory_space<vmem>>, vector<1x4xf32>
    %37 = vector.broadcast %36 : vector<1x4xf32> to vector<2x4xf32>
    %38 = arith.addf %35, %37 : vector<2x4xf32>
    %c0_27 = arith.constant 0 : index
    %c0_28 = arith.constant 0 : index
    %39 = vector.load %arg12[%c0_27, %c0_28] : memref<2x4xf32, #tpu.memory_space<vmem>>, vector<2x4xf32>
    tpu.vector_store %arg12[%c0_27, %c0_28], %38 {strides = array<i32>} : memref<2x4xf32, #tpu.memory_space<vmem>>, vector<2x4xf32>,
    return
  }
  func.func @transform_0(%arg0: i32) -> (i32, i32) {
    %c0_i32 = arith.constant 0 : i32
    %c0_i32_0 = arith.constant 0 : i32
    %c0_i32_1 = arith.constant 0 : i32
    return %c0_i32, %c0_i32_0 : i32, i32
  }
  func.func @transform_1(%arg0: i32) -> (i32, i32) {
    %c0_i32 = arith.constant 0 : i32
    %c0_i32_0 = arith.constant 0 : i32
    %c0_i32_1 = arith.constant 0 : i32
    return %c0_i32, %c0_i32_0 : i32, i32
  }
  func.func @transform_2(%arg0: i32) -> (i32, i32) {
    %c0_i32 = arith.constant 0 : i32
    %c0_i32_0 = arith.constant 0 : i32
    %c0_i32_1 = arith.constant 0 : i32
    return %c0_i32, %c0_i32_0 : i32, i32
  }
  func.func @transform_3(%arg0: i32) -> (i32, i32) {
    %c0_i32 = arith.constant 0 : i32
    %c0_i32_0 = arith.constant 0 : i32
    %c0_i32_1 = arith.constant 0 : i32
    return %c0_i32, %c0_i32_0 : i32, i32
  }
  func.func @transform_4(%arg0: i32) -> (i32, i32) {
    %c0_i32 = arith.constant 0 : i32
    %c0_i32_0 = arith.constant 0 : i32
    %c0_i32_1 = arith.constant 0 : i32
    return %c0_i32, %c0_i32_0 : i32, i32
  }
  func.func @transform_5(%arg0: i32) -> (i32, i32) {
    %c0_i32 = arith.constant 0 : i32
    %c0_i32_0 = arith.constant 0 : i32
    %c0_i32_1 = arith.constant 0 : i32
    return %c0_i32, %c0_i32_0 : i32, i32
  }
  func.func @transform_6(%arg0: i32) -> (i32, i32) {
    %c0_i32 = arith.constant 0 : i32
    %c0_i32_0 = arith.constant 0 : i32
    %c0_i32_1 = arith.constant 0 : i32
    return %c0_i32, %c0_i32_0 : i32, i32
  }
  func.func @transform_7(%arg0: i32) -> (i32, i32) {
    %c0_i32 = arith.constant 0 : i32
    %c0_i32_0 = arith.constant 0 : i32
    %c0_i32_1 = arith.constant 0 : i32
    return %c0_i32, %c0_i32_0 : i32, i32
  }
  func.func @transform_8(%arg0: i32) -> (i32, i32) {
    %c0_i32 = arith.constant 0 : i32
    %c0_i32_0 = arith.constant 0 : i32
    %c0_i32_1 = arith.constant 0 : i32
    return %c0_i32, %c0_i32_0 : i32, i32
  }
  func.func @transform_9(%arg0: i32) -> (i32, i32) {
    %c0_i32 = arith.constant 0 : i32
    %c0_i32_0 = arith.constant 0 : i32
    %c0_i32_1 = arith.constant 0 : i32
    return %c0_i32, %c0_i32_0 : i32, i32
  }
  func.func @transform_10(%arg0: i32) -> (i32, i32) {
    %c0_i32 = arith.constant 0 : i32
    %c0_i32_0 = arith.constant 0 : i32
    %c0_i32_1 = arith.constant 0 : i32
    return %c0_i32, %c0_i32_0 : i32, i32
  }
  func.func @transform_11(%arg0: i32) -> (i32, i32) {
    %c0_i32 = arith.constant 0 : i32
    %c0_i32_0 = arith.constant 0 : i32
    %c0_i32_1 = arith.constant 0 : i32
    return %c0_i32, %c0_i32_0 : i32, i32
  }
}

</mosaic_0001>

<bundles_post_ra>
// kernel: bag_histopathology_rna_forward.3
= control target key start
LH: loop header
LB: loop body
LE: loop exit
PB: predicated region body
PF: predicated region fallthrough
CT: control target
= control target key end

     0   :  { %v553_v3 = vmov 0.0   ;;  %vm554_vm0 = vmmov 0   ;;  %vm52_vm1 = vcmask 130048   ;;  %s887_s0 = inlined_call_operand.vmem [shape: f32[2,128], index: 0, kind: input, shape index: {}]   ;;  %s888_s1 = inlined_call_operand.vmem [shape: f32[2,16], index: 1, kind: input, shape index: {}]   ;;  %s889_s2 = inlined_call_operand.vmem [shape: f32[16,128], index: 2, kind: input, shape index: {}]   ;;  %s890_s3 = inlined_call_operand.vmem [shape: f32[1,128], index: 3, kind: input, shape index: {}]   ;;  %s891_s4 = inlined_call_operand.vmem [shape: f32[128,128], index: 4, kind: input, shape index: {}]   ;;  %s892_s5 = inlined_call_operand.vmem [shape: f32[1,128], index: 5, kind: input, shape index: {}]   ;;  %s893_s6 = inlined_call_operand.vmem [shape: f32[128,128], index: 6, kind: input, shape index: {}]   ;;  %s894_s7 = inlined_call_operand.vmem [shape: f32[128,128], index: 7, kind: input, shape index: {}]   ;;  %s895_s8 = inlined_call_operand.vmem [shape: f32[1,128], index: 8, kind: input, shape index: {}]   ;;  %s896_s9 = inlined_call_operand.vmem [shape: f32[128,4], index: 9, kind: input, shape index: {}]   ;;  %s897_s10 = inlined_call_operand.vmem [shape: f32[1,4], index: 10, kind: input, shape index: {}]   ;;  %s898_s11 = inlined_call_operand.hbm [shape: f32[2,4], index: 11, kind: output, shape index: {}]  }
   0x1   :  { %v41_v0 = vld [vmem:[%s889_s2] sm:$0xff]  ;;  %v42_v1 = vld [vmem:[%s889_s2 + $0x8] sm:$0xff]  ;;  %440 = vmatprep.subr.bf16.mxu0 %v553_v3  ;;  %442 = vmatprep.mubr.msk.bf16.mxu0 %vm554_vm0, %v553_v3  ;;  %v99_v7 = vld [vmem:[%s891_s4 + $0x10] sm:$0xff] }
   0x2   :  { %v40_v2 = vld [vmem:[%s888_s1] sm:$0x3]  ;;  %v44_v4 = vpack.c.bf16 %v42_v1, %v41_v0  ;;  %v98_v6 = vld [vmem:[%s891_s4 + $0x8] sm:$0xff]  ;;  %446 = vmatprep.subr.bf16.mxu1 %v553_v3  ;;  %v100_v10 = vld [vmem:[%s891_s4 + $0x18] sm:$0xff]  ;;  %462 = vmatprep.mubr.msk.bf16.mxu1 %vm554_vm0, %v553_v3 }
   0x3   :  { %v97_v5 = vld [vmem:[%s891_s4] sm:$0xff]  ;;  %v43_v8 = vpack.c.bf16 %v40_v2, %v40_v2  ;;  %v115_v11 = vpack.c.bf16 %v100_v10, %v99_v7  ;;  %v102_v13 = vld [vmem:[%s891_s4 + $0x28] sm:$0xff] }
   0x4   :  { %v114_v9 = vpack.c.bf16 %v98_v6, %v97_v5  ;;  %441 = vmatpush3.bf16.msra.mxu0 %v44_v4  ;;  %v101_v12 = vld [vmem:[%s891_s4 + $0x20] sm:$0xff] }
   0x5   :  { %466 = vmatprep.subr.bf16.mxu0 %v553_v3 }
   0x6   :  { %447 = vmatpush3.bf16.msra.mxu1 %v114_v9 }
   0x7   :  { %448 = vmatprep.subr.bf16.mxu1 %v553_v3 }
   0x8   :  { %16 = vsyncpa [#allocation3], 0  ;;  %443 = vmatmul.mubr.msk.bf16.vlgmr.msra.gmra.mrb[0].mxu0 %vm52_vm1, %v43_v8  ;;  %v116_v14 = vpack.c.bf16 %v102_v13, %v101_v12  ;;  %v103_v15 = vld [vmem:[%s891_s4 + $0x30] sm:$0xff]  ;;  %v104_v16 = vld [vmem:[%s891_s4 + $0x38] sm:$0xff]  ;;  %vm381_vm2 = vcmask 25600  }
   0x9   :  { %482 = vmatprep.mubr.msk.bf16.mxu0 %vm554_vm0, %v553_v3  ;;  %v117_v17 = vpack.c.bf16 %v104_v16, %v103_v15  ;;  %v105_v18 = vld [vmem:[%s891_s4 + $0x40] sm:$0xff]  ;;  %v106_v19 = vld [vmem:[%s891_s4 + $0x48] sm:$0xff]  ;;  %v107_v21 = vld [vmem:[%s891_s4 + $0x50] sm:$0xff] }
   0xa   :  { %449 = vmatpush3.bf16.msra.mxu1 %v115_v11  ;;  %v118_v20 = vpack.c.bf16 %v106_v19, %v105_v18  ;;  %v108_v22 = vld [vmem:[%s891_s4 + $0x58] sm:$0xff]  ;;  %v109_v24 = vld [vmem:[%s891_s4 + $0x60] sm:$0xff]  ;;  %v110_v25 = vld [vmem:[%s891_s4 + $0x68] sm:$0xff] }
   0xb   :  { %450 = vmatprep.subr.bf16.mxu1 %v553_v3  ;;  %v119_v23 = vpack.c.bf16 %v108_v22, %v107_v21  ;;  %v120_v26 = vpack.c.bf16 %v110_v25, %v109_v24  ;;  %v111_v27 = vld [vmem:[%s891_s4 + $0x70] sm:$0xff]  ;;  %v112_v28 = vld [vmem:[%s891_s4 + $0x78] sm:$0xff]  ;;  %v195_v30 = vld [vmem:[%s894_s7] sm:$0xff] }
   0xc   :  { %v121_v29 = vpack.c.bf16 %v112_v28, %v111_v27  ;;  %v196_v31 = vld [vmem:[%s894_s7 + $0x8] sm:$0xff]  ;;  %v197_v33 = vld [vmem:[%s894_s7 + $0x10] sm:$0xff]  ;;  %v198_v34 = vld [vmem:[%s894_s7 + $0x18] sm:$0xff] }
   0xd   :  { %v212_v32 = vpack.c.bf16 %v196_v31, %v195_v30  ;;  %v213_v35 = vpack.c.bf16 %v198_v34, %v197_v33  ;;  %v199_v36 = vld [vmem:[%s894_s7 + $0x20] sm:$0xff]  ;;  %v200_v37 = vld [vmem:[%s894_s7 + $0x28] sm:$0xff]  ;;  %v201_v39 = vld [vmem:[%s894_s7 + $0x30] sm:$0xff] }
   0xe   :  { %451 = vmatpush3.bf16.msra.mxu1 %v116_v14  ;;  %v214_v38 = vpack.c.bf16 %v200_v37, %v199_v36  ;;  %v202_v40 = vld [vmem:[%s894_s7 + $0x38] sm:$0xff]  ;;  %v203_v42 = vld [vmem:[%s894_s7 + $0x40] sm:$0xff]  ;;  %v204_v43 = vld [vmem:[%s894_s7 + $0x48] sm:$0xff] }
   0xf   :  { %452 = vmatprep.subr.bf16.mxu1 %v553_v3  ;;  %467 = vmatpush3.bf16.msra.mxu0 %v212_v32  ;;  %v215_v41 = vpack.c.bf16 %v202_v40, %v201_v39  ;;  %v216_v44 = vpack.c.bf16 %v204_v43, %v203_v42  ;;  %v205_v45 = vld [vmem:[%s894_s7 + $0x50] sm:$0xff]  ;;  %v206_v46 = vld [vmem:[%s894_s7 + $0x58] sm:$0xff]  ;;  %v207_v48 = vld [vmem:[%s894_s7 + $0x60] sm:$0xff] }
  0x10   :  { %468 = vmatprep.subr.bf16.mxu0 %v553_v3  ;;  %v217_v47 = vpack.c.bf16 %v206_v46, %v205_v45  ;;  %v208_v49 = vld [vmem:[%s894_s7 + $0x68] sm:$0xff]  ;;  %v397_v51 = vld [vmem:[%s890_s3] ss:$0 sm:$0xff]  ;;  %v172_v62 = vld [vmem:[%s893_s6 + $0x10] sm:$0xff] }
  0x11   :  { %v218_v50 = vpack.c.bf16 %v208_v49, %v207_v48  ;;  %v170_v55 = vld [vmem:[%s893_s6] sm:$0xff]  ;;  %v171_v56 = vld [vmem:[%s893_s6 + $0x8] sm:$0xff]  ;;  %v173_v63 = vld [vmem:[%s893_s6 + $0x18] sm:$0xff] }
  0x12   :  { %453 = vmatpush3.bf16.msra.mxu1 %v117_v17  ;;  %v187_v60 = vpack.c.bf16 %v171_v56, %v170_v55  ;;  %v188_v0 = vpack.c.bf16 %v173_v63, %v172_v62  ;;  %v174_v1 = vld [vmem:[%s893_s6 + $0x20] sm:$0xff]  ;;  %v175_v2 = vld [vmem:[%s893_s6 + $0x28] sm:$0xff]  ;;  %v176_v5 = vld [vmem:[%s893_s6 + $0x30] sm:$0xff] }
  0x13   :  { %454 = vmatprep.subr.bf16.mxu1 %v553_v3  ;;  %469 = vmatpush3.bf16.msra.mxu0 %v213_v35  ;;  %v189_v4 = vpack.c.bf16 %v175_v2, %v174_v1  ;;  %v177_v6 = vld [vmem:[%s893_s6 + $0x38] sm:$0xff]  ;;  %v178_v8 = vld [vmem:[%s893_s6 + $0x40] sm:$0xff]  ;;  %v179_v9 = vld [vmem:[%s893_s6 + $0x48] sm:$0xff] }
  0x14   :  { %470 = vmatprep.subr.bf16.mxu0 %v553_v3  ;;  %v190_v7 = vpack.c.bf16 %v177_v6, %v176_v5  ;;  %v191_v10 = vpack.c.bf16 %v179_v9, %v178_v8  ;;  %v180_v11 = vld [vmem:[%s893_s6 + $0x50] sm:$0xff]  ;;  %v181_v12 = vld [vmem:[%s893_s6 + $0x58] sm:$0xff]  ;;  %v182_v14 = vld [vmem:[%s893_s6 + $0x60] sm:$0xff] }
  0x15   :  { %v192_v13 = vpack.c.bf16 %v181_v12, %v180_v11  ;;  %v183_v15 = vld [vmem:[%s893_s6 + $0x68] sm:$0xff]  ;;  %v184_v17 = vld [vmem:[%s893_s6 + $0x70] sm:$0xff]  ;;  %v185_v18 = vld [vmem:[%s893_s6 + $0x78] sm:$0xff] }
  0x16   :  { %455 = vmatpush3.bf16.msra.mxu1 %v118_v20  ;;  %v193_v16 = vpack.c.bf16 %v183_v15, %v182_v14  ;;  %v194_v19 = vpack.c.bf16 %v185_v18, %v184_v17  ;;  %v209_v20 = vld [vmem:[%s894_s7 + $0x70] sm:$0xff]  ;;  %v210_v21 = vld [vmem:[%s894_s7 + $0x78] sm:$0xff]  ;;  %v169_v22 = vld [vmem:[%s887_s0] sm:$0x3] }
  0x17   :  { %456 = vmatprep.subr.bf16.mxu1 %v553_v3  ;;  %471 = vmatpush3.bf16.msra.mxu0 %v214_v38  ;;  %v186_v24 = vpack.c.bf16 %v169_v22, %v169_v22  ;;  %v399_v25 = vld [vmem:[%s892_s5] ss:$0 sm:$0xff]  ;;  %v310_v27 = vld [vmem:[%s896_s9 + $0x8] sm:$0xff]  ;;  %v311_v35 = vld [vmem:[%s896_s9 + $0x10] sm:$0xff] }
  0x18   :  { %472 = vmatprep.subr.bf16.mxu0 %v553_v3  ;;  %v312_v36 = vld [vmem:[%s896_s9 + $0x18] sm:$0xff]  ;;  %v313_v38 = vld [vmem:[%s896_s9 + $0x20] sm:$0xff]  ;;  %v314_v39 = vld [vmem:[%s896_s9 + $0x28] sm:$0xff] }
  0x19   :  { %v327_v37 = vpack.c.bf16 %v312_v36, %v311_v35  ;;  %v328_v40 = vpack.c.bf16 %v314_v39, %v313_v38  ;;  %v316_v42 = vld [vmem:[%s896_s9 + $0x38] sm:$0xff]  ;;  %v318_v45 = vld [vmem:[%s896_s9 + $0x48] sm:$0xff]  ;;  %v401_v5 = vld [vmem:[%s897_s10] ss:$0 sm:$0xff] }
  0x1a   :  { %457 = vmatpush3.bf16.msra.mxu1 %v119_v23  ;;  %v219_v23 = vpack.c.bf16 %v210_v21, %v209_v20  ;;  %v320_v48 = vld [vmem:[%s896_s9 + $0x58] sm:$0xff] }
  0x1b   :  { %458 = vmatprep.subr.bf16.mxu1 %v553_v3  ;;  %473 = vmatpush3.bf16.msra.mxu0 %v215_v41  ;;  %v315_v41 = vld [vmem:[%s896_s9 + $0x30] sm:$0xff] }
  0x1c   :  { %474 = vmatprep.subr.bf16.mxu0 %v553_v3  ;;  %v329_v43 = vpack.c.bf16 %v316_v42, %v315_v41 }
  0x1e   :  { %459 = vmatpush3.bf16.msra.mxu1 %v120_v26  ;;  %v309_v26 = vld [vmem:[%s896_s9] sm:$0xff] }
  0x1f   :  { %460 = vmatprep.subr.bf16.mxu1 %v553_v3  ;;  %475 = vmatpush3.bf16.msra.mxu0 %v216_v44  ;;  %v326_v32 = vpack.c.bf16 %v310_v27, %v309_v26  ;;  %v317_v44 = vld [vmem:[%s896_s9 + $0x40] sm:$0xff] }
  0x20   :  { %476 = vmatprep.subr.bf16.mxu0 %v553_v3  ;;  %v330_v46 = vpack.c.bf16 %v318_v45, %v317_v44 }
  0x22   :  { %461 = vmatpush3.bf16.msra.mxu1 %v121_v29 }
  0x23   :  { %486 = vmatprep.subr.bf16.mxu1 %v553_v3  ;;  %477 = vmatpush3.bf16.msra.mxu0 %v217_v47  ;;  %v319_v47 = vld [vmem:[%s896_s9 + $0x50] sm:$0xff] }
  0x24   :  { %478 = vmatprep.subr.bf16.mxu0 %v553_v3  ;;  %v331_v49 = vpack.c.bf16 %v320_v48, %v319_v47 }
  0x27   :  { %479 = vmatpush3.bf16.msra.mxu0 %v218_v50 }
  0x28   :  { %480 = vmatprep.subr.bf16.mxu0 %v553_v3 }
  0x2b   :  { %481 = vmatpush3.bf16.msra.mxu0 %v219_v23 }
  0x2c   :  { %506 = vmatprep.subr.bf16.mxu0 %v553_v3 }
  0xdb   :  { %v90_v52 = vpop.f32.mrb[0].mxu0 }
  0xdc   :  { %v91_v53 = vadd.f32 %v397_v51, %v90_v52  ;;  %v444_v54 = vpop.f32.mrb[1].mxu0 }
  0xdd   :  { %v93_v57 = vpop.f32.mrb[2].mxu0  ;;  %v322_v54 = vld [vmem:[%s896_s9 + $0x68] sm:$0xff] }
  0xde   :  { %v96_v58 = vmax.f32 %v91_v53, 0.0  ;;  %v445_v59 = vpop.f32.mrb[3].mxu0  ;;  %v321_v53 = vld [vmem:[%s896_s9 + $0x60] sm:$0xff]  ;;  %v323_v57 = vld [vmem:[%s896_s9 + $0x70] sm:$0xff] }
  0xdf   :  { %v332_v56 = vpack.c.bf16 %v322_v54, %v321_v53 }
  0xe0   :  { %v113_v61 = vpack.c.bf16 %v96_v58, %v96_v58  ;;  %v324_v58 = vld [vmem:[%s896_s9 + $0x78] sm:$0xff]  ;;  %s555_s9 = smov [#allocation2]  }
  0xe1   :  { %v333_v59 = vpack.c.bf16 %v324_v58, %v323_v57  ;;  %s389_s19 = sshll.u32 %s555_s9, 4  ;;  %s390_s19 = int_to_ptr.vmem [resolvable:$true] %s389_s19 }
  0xe2   :  { %463 = vmatmul.mubr.bf16.vlgmr.msra.gmra.mrb[0].mxu1 %v113_v61  ;;  %v400_v61 = vld [vmem:[%s895_s8] ss:$0 sm:$0xff]  ;;  %s529_s8 = scalar_lea.vmem %s390_s19, 32  ;;  %p534_p1 = scmp.lt.s32.totalorder %s390_s19, %s390_s19 }
  0xe3   :  { %487 = vmatpush3.bf16.msra.mxu1 %v187_v60  ;;  %502 = vmatprep.mubr.msk.bf16.mxu1 %vm554_vm0, %v553_v3  ;;  %p530_p0 = scmp.ne.s32.totalorder %s390_s19, %s529_s8  ;;  %p535_p2 = scmp.lt.s32.totalorder %s529_s8, %s529_s8 }
  0xe4   :  { %488 = vmatprep.subr.bf16.mxu1 %v553_v3 }
  0xe5   :  { %p536_p3 = por %p535_p2, %p534_p1 }
  0xe7   :  { %489 = vmatpush3.bf16.msra.mxu1 %v188_v0  ;;  %p537_p4 = pnand %p536_p3, %p530_p0 }
  0xe8   :  { %490 = vmatprep.subr.bf16.mxu1 %v553_v3 }
  0xeb   :  { %491 = vmatpush3.bf16.msra.mxu1 %v189_v4 }
  0xec   :  { %492 = vmatprep.subr.bf16.mxu1 %v553_v3 }
  0xef   :  { %493 = vmatpush3.bf16.msra.mxu1 %v190_v7 }
  0xf0   :  { %494 = vmatprep.subr.bf16.mxu1 %v553_v3 }
  0xf3   :  { %495 = vmatpush3.bf16.msra.mxu1 %v191_v10 }
  0xf4   :  { %496 = vmatprep.subr.bf16.mxu1 %v553_v3 }
  0xf7   :  { %497 = vmatpush3.bf16.msra.mxu1 %v192_v13 }
  0xf8   :  { %498 = vmatprep.subr.bf16.mxu1 %v553_v3 }
  0xfb   :  { %499 = vmatpush3.bf16.msra.mxu1 %v193_v16 }
  0xfc   :  { %500 = vmatprep.subr.bf16.mxu1 %v553_v3 }
  0xff   :  { %501 = vmatpush3.bf16.msra.mxu1 %v194_v19 }
 0x102   :  { %503 = vmatmul.mubr.bf16.vlgmr.msra.gmra.mrb[4].mxu1 %v186_v24 }
 0x1b5   :  { %v163_v28 = vpop.f32.mrb[0].mxu1 }
 0x1b6   :  { %v164_v29 = vadd.f32 %v399_v25, %v163_v28  ;;  %v464_v30 = vpop.f32.mrb[1].mxu1 }
 0x1b7   :  { %v166_v31 = vpop.f32.mrb[2].mxu1 }
 0x1b8   :  { %v211_v33 = vpack.c.bf16 %v164_v29, %v164_v29  ;;  %v465_v34 = vpop.f32.mrb[3].mxu1 }
 0x1ba   :  { %483 = vmatmul.mubr.bf16.vlgmr.msra.gmra.mrb[4].mxu0 %v211_v33 }
 0x1bb   :  { %507 = vmatpush3.bf16.msra.mxu0 %v326_v32  ;;  %522 = vmatprep.mubr.msk.bf16.mxu0 %vm554_vm0, %v553_v3 }
 0x1bc   :  { %508 = vmatprep.subr.bf16.mxu0 %v553_v3 }
 0x1bf   :  { %509 = vmatpush3.bf16.msra.mxu0 %v327_v37 }
 0x1c0   :  { %510 = vmatprep.subr.bf16.mxu0 %v553_v3 }
 0x1c3   :  { %511 = vmatpush3.bf16.msra.mxu0 %v328_v40 }
 0x1c4   :  { %512 = vmatprep.subr.bf16.mxu0 %v553_v3 }
 0x1c7   :  { %513 = vmatpush3.bf16.msra.mxu0 %v329_v43 }
 0x1c8   :  { %514 = vmatprep.subr.bf16.mxu0 %v553_v3 }
 0x1cb   :  { %515 = vmatpush3.bf16.msra.mxu0 %v330_v46 }
 0x1cc   :  { %516 = vmatprep.subr.bf16.mxu0 %v553_v3 }
 0x1cf   :  { %517 = vmatpush3.bf16.msra.mxu0 %v331_v49 }
 0x1d0   :  { %518 = vmatprep.subr.bf16.mxu0 %v553_v3 }
 0x1d3   :  { %519 = vmatpush3.bf16.msra.mxu0 %v332_v56 }
 0x1d4   :  { %520 = vmatprep.subr.bf16.mxu0 %v553_v3 }
 0x1d5   :  { %v294_v50 = vpop.f32.mrb[4].mxu1 }
 0x1d6   :  { %v504_v51 = vpop.f32.mrb[5].mxu1 }
 0x1d7   :  { %v297_v52 = vpop.f32.mrb[6].mxu1  ;;  %521 = vmatpush3.bf16.msra.mxu0 %v333_v59 }
 0x1d8   :  { %v505_v55 = vpop.f32.mrb[7].mxu1 }
 0x28d   :  { %v254_v60 = vpop.f32.mrb[4].mxu0 }
 0x28e   :  { %v295_v62 = vadd.f32 %v294_v50, %v254_v60  ;;  %v484_v63 = vpop.f32.mrb[5].mxu0 }
 0x28f   :  { %v257_v0 = vpop.f32.mrb[6].mxu0 }
 0x290   :  { %v307_v1 = vadd.f32 %v400_v61, %v295_v62  ;;  %v485_v3 = vpop.f32.mrb[7].mxu0 }
 0x292   :  { %v308_v2 = vmax.f32 %v307_v1, 0.0 }
 0x294   :  { %v325_v4 = vpack.c.bf16 %v308_v2, %v308_v2 }
 0x296   :  { %523 = vmatmul.mubr.bf16.vlgmr.msra.gmra.mrb[8].mxu0 %v325_v4 }
 0x369   :  { %v375_v6 = vpop.f32.mrb[8].mxu0 }
 0x36a   :  { %v376_v7 = vadd.f32 %v401_v5, %v375_v6  ;;  %v524_v8 = vpop.f32.mrb[9].mxu0 }
 0x36b   :  { %v378_v9 = vpop.f32.mrb[10].mxu0 }
 0x36c   :  { %v525_v10 = vpop.f32.mrb[11].mxu0  ;;  %382 = vst.msk [vmem:[#allocation2] sm:$0x3] %vm381_vm2, %v376_v7 }
 0x36d   :  { %540 = shalt.err (!%p537_p4)
}
 0x36e   :  { %s541_s10 = scalar_lea.hbm %s898_s11, 32 }
 0x36f   :  { %p542_p5 = scmp.ne.s32.totalorder %s898_s11, %s541_s10  ;;  %p545_p6 = scmp.lt.u32.totalorder %s541_s10, %s898_s11 }
 0x371   :  { %p547_p7 = pnand %p545_p6, %p542_p5 }
 0x373   :  { %550 = shalt.err (!%p547_p7)
}
 0x374   :  { %392 = dma.vmem_to_hbm [thread:$0]  %s390_s19, 32, %s898_s11, [#allocation3]  }
 0x375   :  { %551 = dma.done.wait [#allocation3], 32  }
 0x376   :  { %552 = vsyncadd [#allocation3], 4294967264 }
 0x377   :  { %396 = vsyncpa [#allocation3], 1 }

// kernel: bag_histopathology_rna_forward.2
= control target key start
LH: loop header
LB: loop body
LE: loop exit
PB: predicated region body
PF: predicated region fallthrough
CT: control target
= control target key end

     0   :  { %s2761_s18 = smov 0   ;;  %s2763_s19 = smov 0   ;;  %s3549_s0 = inlined_call_operand.vmem [shape: f32[2,3,10,10,3], index: 0, kind: input, shape index: {}]   ;;  %s3550_s1 = inlined_call_operand.vmem [shape: f32[9,3,32], index: 1, kind: input, shape index: {}]   ;;  %s3551_s2 = inlined_call_operand.vmem [shape: f32[1,32], index: 2, kind: input, shape index: {}]   ;;  %s3552_s3 = inlined_call_operand.vmem [shape: f32[32,128], index: 3, kind: input, shape index: {}]   ;;  %s3553_s4 = inlined_call_operand.vmem [shape: f32[1,128], index: 4, kind: input, shape index: {}]   ;;  %s3554_s5 = inlined_call_operand.vmem [shape: f32[2,128], index: 5, kind: output, shape index: {}]  }
   0x1   :  { %s2765_s20 = smov 0   ;;  %s2767_s21 = smov 0  }
   0x2   :  { %s2769_s22 = smov 0  }
   0x3 LB: > { %s24_s23 = sadd.s32 1, %s2721_s21  ;;  %p43_p1 = scmp.ne.s32.totalorder %s2713_s19, %s2709_s18  ;;  %s2725_s22 = sphi %s2769_s22, %s15_s22   ;;  %s2721_s21 = sphi %s2767_s21, %s3607_s21   ;;  %s2717_s20 = sphi %s2765_s20, %s3606_s20   ;;  %s2713_s19 = sphi %s2763_s19, %s3605_s19   ;;  %s2709_s18 = sphi %s2761_s18, %s3604_s18  }
   0x4   : > { %p25_p0 = scmp.ge.s32.totalorder %s24_s23, 3  ;;  %p44_p2 = scmp.eq.s32.totalorder %s2725_s22, 0 }
   0x5   : > { %s36_s25 = sadd.s32 1, %s2713_s19  ;;  %p2165_p5 = scmp.ge.s32.totalorder %s2725_s22, 3 }
   0x6   : > { %s3609_s23 = smov (%p25_p0, %s24_s23), 0  ;;  %p45_p3 = por %p44_p2, %p43_p1 }
   0x7   : > { %s32_s24 = ssub.s32 %s2721_s21, %s3609_s23  ;;  %191 = sbr.rel (%p2165_p5) target bundleno = 39 (0x27), region = 32 }
   0x8   : > { %p34_p4 = scmp.eq.s32.totalorder %s32_s24, 0 }
   0xa   : > { %s2796_s26 = scalar_select %p34_p4, %s2713_s19, %s36_s25  }
   0xe   : > { %194 = sbr.rel (!%p45_p3) target bundleno = 39 (0x27), region = 36  ;;  %s196_s27 = sand.u32 (%p45_p3), 1, %s2713_s19  }
   0xf   : > { %s2641_s28 = smul.u32 (%p45_p3), 160, %s2721_s21 }
  0x10   : > { %s2640_s29 = smul.u32 (%p45_p3), 320, %s196_s27 }
  0x11   : > { %s2804_s7 = scalar_lea.vmem (%p45_p3), %s3549_s0, %s2641_s28 }
  0x12   : > { %v310_v0 = vld [vmem:[%s2804_s7] sm:$0xff] (%p45_p3)  ;;  %v312_v1 = vld [vmem:[%s2804_s7 + $0x8] sm:$0xff] (%p45_p3)  ;;  %v314_v2 = vld [vmem:[%s2804_s7 + $0x10] sm:$0xff] (%p45_p3)  ;;  %s2809_s8 = scalar_lea.vmem (%p45_p3), [#allocation3], %s2640_s29 }
  0x13   : > { %311 = vst [vmem:[%s2809_s8] sm:$0xff] (%p45_p3), %v310_v0  ;;  %313 = vst [vmem:[%s2809_s8 + $0x8] sm:$0xff] (%p45_p3), %v312_v1  ;;  %v316_v3 = vld [vmem:[%s2804_s7 + $0x18] sm:$0xff] (%p45_p3)  ;;  %v318_v4 = vld [vmem:[%s2804_s7 + $0x20] sm:$0xff] (%p45_p3) }
  0x14   : > { %315 = vst [vmem:[%s2809_s8 + $0x10] sm:$0xff] (%p45_p3), %v314_v2  ;;  %v320_v5 = vld [vmem:[%s2804_s7 + $0x28] sm:$0xff] (%p45_p3)  ;;  %317 = vst [vmem:[%s2809_s8 + $0x18] sm:$0xff] (%p45_p3), %v316_v3  ;;  %v322_v6 = vld [vmem:[%s2804_s7 + $0x30] sm:$0xff] (%p45_p3) }
  0x15   : > { %319 = vst [vmem:[%s2809_s8 + $0x20] sm:$0xff] %v318_v4  ;;  %321 = vst [vmem:[%s2809_s8 + $0x28] sm:$0xff] %v320_v5  ;;  %v324_v7 = vld [vmem:[%s2804_s7 + $0x38] sm:$0xff]  ;;  %v326_v8 = vld [vmem:[%s2804_s7 + $0x40] sm:$0xff] }
  0x16   : > { %323 = vst [vmem:[%s2809_s8 + $0x30] sm:$0xff] %v322_v6  ;;  %325 = vst [vmem:[%s2809_s8 + $0x38] sm:$0xff] %v324_v7  ;;  %v328_v9 = vld [vmem:[%s2804_s7 + $0x48] sm:$0xff]  ;;  %v330_v10 = vld [vmem:[%s2804_s7 + $0x50] sm:$0xff] }
  0x17   : > { %327 = vst [vmem:[%s2809_s8 + $0x40] sm:$0xff] %v326_v8  ;;  %v332_v11 = vld [vmem:[%s2804_s7 + $0x58] sm:$0xff]  ;;  %329 = vst [vmem:[%s2809_s8 + $0x48] sm:$0xff] %v328_v9  ;;  %v334_v12 = vld [vmem:[%s2804_s7 + $0x60] sm:$0xff] }
  0x18   : > { %331 = vst [vmem:[%s2809_s8 + $0x50] sm:$0xff] %v330_v10  ;;  %333 = vst [vmem:[%s2809_s8 + $0x58] sm:$0xff] %v332_v11  ;;  %v336_v13 = vld [vmem:[%s2804_s7 + $0x68] sm:$0xff]  ;;  %v338_v14 = vld [vmem:[%s2804_s7 + $0x70] sm:$0xff] }
  0x19   : > { %335 = vst [vmem:[%s2809_s8 + $0x60] sm:$0xff] %v334_v12  ;;  %337 = vst [vmem:[%s2809_s8 + $0x68] sm:$0xff] %v336_v13  ;;  %v340_v15 = vld [vmem:[%s2804_s7 + $0x78] sm:$0xff]  ;;  %v342_v16 = vld [vmem:[%s2804_s7 + $0x80] sm:$0xff] }
  0x1a   : > { %339 = vst [vmem:[%s2809_s8 + $0x70] sm:$0xff] %v338_v14  ;;  %v344_v17 = vld [vmem:[%s2804_s7 + $0x88] sm:$0xff]  ;;  %341 = vst [vmem:[%s2809_s8 + $0x78] sm:$0xff] %v340_v15  ;;  %v346_v18 = vld [vmem:[%s2804_s7 + $0x90] sm:$0xff] }
  0x1b   : > { %343 = vst [vmem:[%s2809_s8 + $0x80] sm:$0xff] %v342_v16  ;;  %345 = vst [vmem:[%s2809_s8 + $0x88] sm:$0xff] %v344_v17  ;;  %v348_v19 = vld [vmem:[%s2804_s7 + $0x98] sm:$0xff]  ;;  %v350_v20 = vld [vmem:[%s2804_s7 + $0x1e0] sm:$0xff] }
  0x1c   : > { %347 = vst [vmem:[%s2809_s8 + $0x90] sm:$0xff] %v346_v18  ;;  %349 = vst [vmem:[%s2809_s8 + $0x98] sm:$0xff] %v348_v19  ;;  %v352_v21 = vld [vmem:[%s2804_s7 + $0x1e8] sm:$0xff]  ;;  %v354_v22 = vld [vmem:[%s2804_s7 + $0x1f0] sm:$0xff] }
  0x1d   : > { %351 = vst [vmem:[%s2809_s8 + $0xa0] sm:$0xff] %v350_v20  ;;  %v356_v23 = vld [vmem:[%s2804_s7 + $0x1f8] sm:$0xff]  ;;  %353 = vst [vmem:[%s2809_s8 + $0xa8] sm:$0xff] %v352_v21  ;;  %v358_v24 = vld [vmem:[%s2804_s7 + $0x200] sm:$0xff] }
  0x1e   : > { %355 = vst [vmem:[%s2809_s8 + $0xb0] sm:$0xff] %v354_v22  ;;  %357 = vst [vmem:[%s2809_s8 + $0xb8] sm:$0xff] %v356_v23  ;;  %v360_v25 = vld [vmem:[%s2804_s7 + $0x208] sm:$0xff]  ;;  %v362_v26 = vld [vmem:[%s2804_s7 + $0x210] sm:$0xff] }
  0x1f   : > { %359 = vst [vmem:[%s2809_s8 + $0xc0] sm:$0xff] %v358_v24  ;;  %361 = vst [vmem:[%s2809_s8 + $0xc8] sm:$0xff] %v360_v25  ;;  %v364_v27 = vld [vmem:[%s2804_s7 + $0x218] sm:$0xff]  ;;  %v366_v28 = vld [vmem:[%s2804_s7 + $0x220] sm:$0xff] }
  0x20   : > { %363 = vst [vmem:[%s2809_s8 + $0xd0] sm:$0xff] %v362_v26  ;;  %v368_v29 = vld [vmem:[%s2804_s7 + $0x228] sm:$0xff]  ;;  %365 = vst [vmem:[%s2809_s8 + $0xd8] sm:$0xff] %v364_v27  ;;  %v370_v30 = vld [vmem:[%s2804_s7 + $0x230] sm:$0xff] }
  0x21   : > { %367 = vst [vmem:[%s2809_s8 + $0xe0] sm:$0xff] %v366_v28  ;;  %369 = vst [vmem:[%s2809_s8 + $0xe8] sm:$0xff] %v368_v29  ;;  %v372_v31 = vld [vmem:[%s2804_s7 + $0x238] sm:$0xff]  ;;  %v374_v32 = vld [vmem:[%s2804_s7 + $0x240] sm:$0xff] }
  0x22   : > { %371 = vst [vmem:[%s2809_s8 + $0xf0] sm:$0xff] %v370_v30  ;;  %373 = vst [vmem:[%s2809_s8 + $0xf8] sm:$0xff] %v372_v31  ;;  %v376_v33 = vld [vmem:[%s2804_s7 + $0x248] sm:$0xff]  ;;  %v378_v34 = vld [vmem:[%s2804_s7 + $0x250] sm:$0xff] }
  0x23   : > { %375 = vst [vmem:[%s2809_s8 + $0x100] sm:$0xff] %v374_v32  ;;  %v380_v35 = vld [vmem:[%s2804_s7 + $0x258] sm:$0xff]  ;;  %377 = vst [vmem:[%s2809_s8 + $0x108] sm:$0xff] %v376_v33  ;;  %v382_v36 = vld [vmem:[%s2804_s7 + $0x260] sm:$0xff] }
  0x24   : > { %379 = vst [vmem:[%s2809_s8 + $0x110] sm:$0xff] %v378_v34  ;;  %381 = vst [vmem:[%s2809_s8 + $0x118] sm:$0xff] %v380_v35  ;;  %v384_v37 = vld [vmem:[%s2804_s7 + $0x268] sm:$0xff]  ;;  %v386_v38 = vld [vmem:[%s2804_s7 + $0x270] sm:$0xff] }
  0x25   : > { %383 = vst [vmem:[%s2809_s8 + $0x120] sm:$0xff] %v382_v36  ;;  %385 = vst [vmem:[%s2809_s8 + $0x128] sm:$0xff] %v384_v37  ;;  %v388_v39 = vld [vmem:[%s2804_s7 + $0x278] sm:$0xff] }
  0x26   : > { %387 = vst [vmem:[%s2809_s8 + $0x130] sm:$0xff] %v386_v38  ;;  %389 = vst [vmem:[%s2809_s8 + $0x138] sm:$0xff] %v388_v39 }
  0x27 PF: > { %p2167_p6 = scmp.ge.s32.totalorder %s2725_s22, 1  ;;  %p394_p7 = scmp.lt.s32.totalorder %s2725_s22, 4 }
  0x29   : > { %p395_p8 = pnand %p2167_p6, %p394_p7 }
  0x2b   : > { %398 = sbr.rel (%p395_p8) target bundleno = 677 (0x2a5), region = 74 }
  0x32   : > { %s401_s9 = sand.u32 1, %s2709_s18   ;;  %p2168_p9 = scmp.ne.s32.totalorder %s2717_s20, 0 }
  0x33   : > { %s2642_s10 = smul.u32 320, %s401_s9  ;;  %vm437_vm0 = vcmask (!%p2168_p9), 254976   ;;  %v2727_v40 = vmov (!%p2168_p9), 0.0  }
  0x34   : > { %436 = sbr.rel (%p2168_p9) target bundleno = 59 (0x3b), region = 82  ;;  %438 = vst.msk [vmem:[#allocation2] sm:$0x3] (!%p2168_p9), %vm437_vm0, %v2727_v40 }
  0x35   : > { %s2891_s11 = scalar_lea.vmem [#allocation3], %s2642_s10 }
  0x3b PF: > { %v2169_v41 = vld [vmem:[%s3550_s1 + $0x4] sm:$0x7]  ;;  %vm622_vm1 = vcmask 1040384   ;;  %vm623_vm2 = vcmask 1041408   ;;  %v2728_v44 = vmov 65535   ;;  %v2907_v48 = vld [vmem:[%s2891_s11 + $0x10] sm:$0xff] }
  0x3c   : > { %v2898_v42 = vld [vmem:[%s2891_s11] sm:$0xff]  ;;  %v596_v43 = vpack.c.bf16 %v2169_v41, %v2169_v41  ;;  %v624_v45 = vsel %vm622_vm1, 4294967295, %v2728_v44  ;;  %v2204_v46 = vld [vmem:[%s3550_s1 + $0x10] sm:$0x7]  ;;  %v2904_v47 = vld [vmem:[%s2891_s11 + $0x8] sm:$0x3] }
  0x3d   : > { %v2909_v49 = vsel %vm623_vm2, %v624_v45, 0  ;;  %v1239_v50 = vpack.c.bf16 %v2204_v46, %v2204_v46  ;;  %v2912_v51 = vld [vmem:[%s2891_s11 + $0x18] sm:$0x3]  ;;  %vm521_vm3 = vcmask 1046528   ;;  %v522_v52 = vrot.slane %v2898_v42, 1  ;;  %v2916_v53 = vld [vmem:[%s2891_s11 + $0x20] sm:$0xff] }
  0x3e   : > { %v627_v54 = vand.u32 %v2909_v49, %v596_v43  ;;  %v523_v55 = vrot.slane %v2904_v47, 1  ;;  %v525_v56 = vrot.slane %v2907_v48, 1  ;;  %v526_v57 = vrot.slane %v2912_v51, 1  ;;  %v2923_v58 = vld [vmem:[%s2891_s11 + $0x28] sm:$0x3]  ;;  %v2926_v59 = vld [vmem:[%s2891_s11 + $0x30] sm:$0xff] }
  0x3f   : > { %3568 = vst [vmem:[#allocation4_spill] sm:$0xff] %v2926_v59  ;;  %v2929_v60 = vand.u32 %v1239_v50, %v2909_v49  ;;  %v2932_v61 = vld [vmem:[%s2891_s11 + $0x38] sm:$0x3]  ;;  %v2935_v62 = vld [vmem:[%s2891_s11 + $0x40] sm:$0xff]  ;;  %vm597_vm4 = vcmask 23552   ;;  %v855_v1 = vrot.slane %v2912_v51, 2 }
  0x40   : > { %3569 = vst [vmem:[#allocation5_spill] sm:$0xff] %v2935_v62  ;;  %2340 = vmatprep.subr.bf16.mxu1 %v627_v54  ;;  %v524_v63 = vsel %vm521_vm3, %v522_v52, %v523_v55  ;;  %v527_v0 = vsel %vm521_vm3, %v525_v56, %v526_v57  ;;  %v2941_v2 = vld [vmem:[%s2891_s11 + $0x48] sm:$0x3]  ;;  %v479_v3 = vld [vmem:[%s3550_s1] sm:$0x7]  ;;  %v528_v5 = vrot.slane %v2916_v53, 1 }
  0x41   : > { %2412 = vmatprep.subr.bf16.mxu0 %v2929_v60  ;;  %2341 = vmatpush3.bf16.msra.mxu1 %v627_v54  ;;  %v588_v4 = vpack.c.bf16 %v527_v0, %v524_v63  ;;  %v529_v6 = vrot.slane %v2923_v58, 1  ;;  %v531_v7 = vrot.slane %v2926_v59, 1  ;;  %v2213_v8 = vld [vmem:[%s3550_s1 + $0x14] sm:$0x7]  ;;  %v532_v9 = vrot.slane %v2932_v61, 1  ;;  %v2962_v14 = vld [vmem:[%s2891_s11 + $0x60] sm:$0xff] }
  0x42   : > { %2413 = vmatpush3.bf16.msra.mxu0 %v2929_v60  ;;  %v534_v10 = vrot.slane %v2935_v62, 1  ;;  %v535_v11 = vrot.slane %v2941_v2, 1  ;;  %v858_v12 = vrot.slane %v2923_v58, 2  ;;  %v2959_v13 = vld [vmem:[%s2891_s11 + $0x50] sm:$0xff]  ;;  %v861_v16 = vrot.slane %v2932_v61, 2  ;;  %v2985_v27 = vld [vmem:[%s2891_s11 + $0x80] sm:$0xff] }
  0x43   : > { %3570 = vst [vmem:[#allocation6_spill] sm:$0xff] %v2959_v13  ;;  %2342 = vmatprep.mubr.msk.bf16.mxu1 %vm597_vm4, %v588_v4  ;;  %v530_v15 = vsel %vm521_vm3, %v528_v5, %v529_v6  ;;  %v864_v17 = vrot.slane %v2941_v2, 2  ;;  %v2971_v19 = vld [vmem:[%s2891_s11 + $0x58] sm:$0x3]  ;;  %v2974_v20 = vld [vmem:[%s2891_s11 + $0x68] sm:$0x3]  ;;  %v533_v21 = vsel %vm521_vm3, %v531_v7, %v532_v9  ;;  %v488_v24 = vpack.c.bf16 %v479_v3, %v479_v3 }
  0x44   : > { %v536_v22 = vsel %vm521_vm3, %v534_v10, %v535_v11  ;;  %v1231_v23 = vpack.c.bf16 %v530_v15, %v527_v0  ;;  %v2979_v25 = vld [vmem:[%s2891_s11 + $0x70] sm:$0xff]  ;;  %v2982_v26 = vld [vmem:[%s2891_s11 + $0x78] sm:$0x3]  ;;  %v2987_v28 = vpack.c.bf16 %v533_v21, %v530_v15  ;;  %v1398_v30 = vpack.c.bf16 %v2213_v8, %v2213_v8  ;;  %v2991_v32 = vld [vmem:[%s2891_s11 + $0x88] sm:$0x3]  ;;  %p2250_p10 = scmp.ne.s32.totalorder %s2717_s20, 2 }
  0x45   : > { %v1232_v29 = vpack.c.bf16 %v536_v22, %v533_v21  ;;  %v537_v31 = vrot.slane %v2959_v13, 1  ;;  %v2994_v33 = vld [vmem:[%s2891_s11 + $0xa0] sm:$0xff]  ;;  %v751_v34 = vand.u32 %v2909_v49, %v488_v24  ;;  %v538_v35 = vrot.slane %v2971_v19, 1  ;;  %v3002_v38 = vld [vmem:[%s2891_s11 + $0xa8] sm:$0x3]  ;;  %v3012_v44 = vld [vmem:[%s2891_s11 + $0xb0] sm:$0xff] }
  0x46   : > { %2414 = vmatprep.mubr.msk.bf16.mxu0 %vm597_vm4, %v1231_v23  ;;  %v540_v36 = vrot.slane %v2962_v14, 1  ;;  %v541_v37 = vrot.slane %v2974_v20, 1  ;;  %2343 = vmatmul.mubr.msk.bf16.vlgmr.msra.gmra.mrb[0].mxu1 %vm597_vm4, %v2987_v28  ;;  %v1424_v39 = vand.u32 %v1398_v30, %v2909_v49  ;;  %v543_v40 = vrot.slane %v2979_v25, 1  ;;  %v3015_v45 = vld [vmem:[%s2891_s11 + $0xb8] sm:$0x3]  ;;  %v3033_v6 = vld [vmem:[%s2891_s11 + $0xc0] sm:$0xff] }
  0x47   : > { %2415 = vmatmul.mubr.msk.bf16.vlgmr.msra.gmra.mrb[0].mxu0 %vm597_vm4, %v1232_v29  ;;  %v544_v41 = vrot.slane %v2982_v26, 1  ;;  %v1221_v43 = vrot.slane %v2985_v27, 1  ;;  %2358 = vmatprep.subr.bf16.mxu1 %v751_v34  ;;  %v539_v46 = vsel %vm521_vm3, %v537_v31, %v538_v35  ;;  %v1222_v52 = vrot.slane %v2991_v32, 1  ;;  %v3036_v7 = vld [vmem:[%s2891_s11 + $0xc8] sm:$0x3]  ;;  %v3045_v11 = vld [vmem:[%s2891_s11 + $0xd0] sm:$0xff] }
  0x48   : > { %v542_v50 = vsel %vm521_vm3, %v540_v36, %v541_v37  ;;  %v546_v54 = vrot.slane %v2994_v33, 1  ;;  %2430 = vmatprep.subr.bf16.mxu0 %v1424_v39  ;;  %2359 = vmatpush3.bf16.msra.mxu1 %v751_v34  ;;  %v3021_v55 = vpack.c.bf16 %v539_v46, %v536_v22  ;;  %v547_v63 = vrot.slane %v3002_v38, 1  ;;  %v3048_v15 = vld [vmem:[%s2891_s11 + $0xd8] sm:$0x3]  ;;  %v3068_v36 = vld [vmem:[%s2891_s11 + $0xe0] sm:$0xff] }
  0x49   : > { %v1233_v56 = vpack.c.bf16 %v542_v50, %v539_v46  ;;  %v545_v57 = vsel %vm521_vm3, %v543_v40, %v544_v41  ;;  %2431 = vmatpush3.bf16.msra.mxu0 %v1424_v39  ;;  %v3028_v3 = vsel %vm521_vm3, %v1221_v43, %v1222_v52  ;;  %v549_v4 = vrot.slane %v3012_v44, 1  ;;  %v2222_v29 = vld [vmem:[%s3550_s1 + $0x18] sm:$0x7]  ;;  %v3071_v37 = vld [vmem:[%s2891_s11 + $0xe8] sm:$0x3] }
  0x4a   : > { %3571 = vst [vmem:[#allocation7_spill] sm:$0xff] %v3021_v55  ;;  %v3025_v0 = vpack.c.bf16 %v545_v57, %v542_v50  ;;  %v550_v5 = vrot.slane %v3015_v45, 1  ;;  %2346 = vmatprep.mubr.msk.bf16.mxu1 %vm597_vm4, %v3021_v55  ;;  %v1234_v8 = vpack.c.bf16 %v3028_v3, %v545_v57  ;;  %v548_v9 = vsel %vm521_vm3, %v546_v54, %v547_v63  ;;  %v3090_v41 = vld [vmem:[%s2891_s11 + $0xf0] sm:$0xff]  ;;  %v3093_v43 = vld [vmem:[%s2891_s11 + $0xf8] sm:$0x3]  ;;  %v3117_v57 = vld [vmem:[%s2891_s11 + $0x100] sm:$0xff] }
  0x4b   : > { %2418 = vmatprep.mubr.msk.bf16.mxu0 %vm597_vm4, %v1233_v56  ;;  %vm850_vm5 = vcmask 1045504   ;;  %v854_v10 = vrot.slane %v2907_v48, 2  ;;  %v857_v22 = vrot.slane %v2916_v53, 2  ;;  %v860_v23 = vrot.slane %v2926_v59, 2  ;;  %v3120_v63 = vld [vmem:[%s2891_s11 + $0x108] sm:$0x3] }
  0x4c   : > { %3572 = vst [vmem:[#allocation8_spill] sm:$0xff] %v3025_v0  ;;  %v3051_v21 = vsel %vm521_vm3, %v549_v4, %v550_v5  ;;  %v863_v24 = vrot.slane %v2935_v62, 2  ;;  %v552_v34 = vrot.slane %v3033_v6, 1  ;;  %v553_v35 = vrot.slane %v3036_v7, 1 }
  0x4d   : > { %v592_v30 = vpack.c.bf16 %v3051_v21, %v548_v9  ;;  %v3063_v31 = vsel %vm850_vm5, %v854_v10, %v855_v1  ;;  %v3076_v39 = vsel %vm850_vm5, %v857_v22, %v858_v12  ;;  %v3081_v51 = vsel %vm850_vm5, %v860_v23, %v861_v16  ;;  %v3132_v10 = vld [vmem:[%s2891_s11 + $0x110] sm:$0xff]  ;;  %v3135_v22 = vld [vmem:[%s2891_s11 + $0x118] sm:$0x3] }
  0x4e   : > { %v3086_v1 = vsel %vm850_vm5, %v863_v24, %v864_v17  ;;  %v555_v40 = vrot.slane %v3045_v11, 1  ;;  %2347 = vmatmul.mubr.msk.bf16.gmra.mrb[4].mxu1 %vm597_vm4, %v3025_v0  ;;  %v1390_v58 = vpack.c.bf16 %v3076_v39, %v3063_v31  ;;  %v556_v2 = vrot.slane %v3048_v15, 1 }
  0x4f   : > { %2419 = vmatmul.mubr.msk.bf16.gmra.mrb[4].mxu0 %vm597_vm4, %v1234_v8  ;;  %v1391_v61 = vpack.c.bf16 %v3086_v1, %v3081_v51  ;;  %2350 = vmatprep.mubr.msk.bf16.mxu1 %vm597_vm4, %v592_v30  ;;  %v3105_v12 = vsel %vm521_vm3, %v552_v34, %v553_v35  ;;  %v1543_v16 = vpack.c.bf16 %v2222_v29, %v2222_v29  ;;  %v558_v17 = vrot.slane %v3068_v36, 1 }
  0x50   : > { %v559_v46 = vrot.slane %v3071_v37, 1  ;;  %2432 = vmatprep.mubr.msk.bf16.mxu0 %vm597_vm4, %v1390_v58  ;;  %v3111_v50 = vsel %vm521_vm3, %v555_v40, %v556_v2  ;;  %v561_v52 = vrot.slane %v3090_v41, 1  ;;  %v562_v54 = vrot.slane %v3093_v43, 1 }
  0x51   : > { %3573 = vst [vmem:[#allocation9_spill] sm:$0xff] %v3111_v50  ;;  %v866_v56 = vrot.slane %v2959_v13, 2  ;;  %v3124_v4 = vpack.c.bf16 %v3111_v50, %v3105_v12  ;;  %v1551_v5 = vand.u32 %v1543_v16, %v2909_v49  ;;  %v867_v9 = vrot.slane %v2971_v19, 2  ;;  %v2231_v50 = vld [vmem:[%s3550_s1 + $0x1c] sm:$0x7] }
  0x52   : > { %v3128_v8 = vsel %vm521_vm3, %v558_v17, %v559_v46  ;;  %v3138_v23 = vsel %vm521_vm3, %v561_v52, %v562_v54  ;;  %v869_v29 = vrot.slane %v2962_v14, 2  ;;  %v870_v30 = vrot.slane %v2974_v20, 2  ;;  %v2186_v54 = vld [vmem:[%s3550_s1 + $0x8] sm:$0x7] }
  0x53   : > { %3574 = vst [vmem:[#allocation10_spill] sm:$0xff] %v3124_v4  ;;  %3575 = vst [vmem:[#allocation11_spill] sm:$0xff] %v3128_v8  ;;  %2448 = vmatprep.subr.bf16.mxu0 %v1551_v5  ;;  %v3146_v34 = vpack.c.bf16 %v3138_v23, %v3128_v8  ;;  %v3149_v19 = vsel %vm850_vm5, %v866_v56, %v867_v9  ;;  %v564_v35 = vrot.slane %v3117_v57, 1  ;;  %v565_v40 = vrot.slane %v3120_v63, 1 }
  0x54   : > { %v3154_v58 = vsel %vm850_vm5, %v869_v29, %v870_v30  ;;  %v567_v2 = vrot.slane %v3132_v10, 1  ;;  %v568_v16 = vrot.slane %v3135_v22, 1  ;;  %v872_v20 = vrot.slane %v2979_v25, 2 }
  0x55   : > { %3576 = vst [vmem:[#allocation12_spill] sm:$0xff] %v3146_v34  ;;  %v1392_v17 = vpack.c.bf16 %v3154_v58, %v3149_v19  ;;  %v873_v46 = vrot.slane %v2982_v26, 2  ;;  %v1380_v52 = vrot.slane %v2985_v27, 2  ;;  %v3170_v56 = vsel %vm521_vm3, %v564_v35, %v565_v40 }
  0x56   : > { %2351 = vmatmul.mubr.msk.bf16.gmra.mrb[8].mxu1 %vm597_vm4, %v3124_v4  ;;  %v3173_v9 = vsel %vm521_vm3, %v567_v2, %v568_v16  ;;  %v1381_v29 = vrot.slane %v2991_v32, 2  ;;  %v878_v26 = vrot.slane %v3012_v44, 2  ;;  %v879_v24 = vrot.slane %v3015_v45, 2  ;;  %v458_v4 = vld [vmem:[%s2891_s11 + $0x98] sm:$0x3] }
  0x57   : > { %2433 = vmatmul.mubr.msk.bf16.vlgmr.msra.gmra.mrb[0].mxu0 %vm597_vm4, %v1391_v61  ;;  %2354 = vmatprep.mubr.msk.bf16.mxu1 %vm597_vm4, %v3146_v34  ;;  %v3180_v30 = vsel %vm850_vm5, %v872_v20, %v873_v46  ;;  %v881_v61 = vrot.slane %v3033_v6, 2  ;;  %v882_v32 = vrot.slane %v3036_v7, 2  ;;  %v884_v40 = vrot.slane %v3045_v11, 2  ;;  %v3258_v34 = vld [vmem:[%s2891_s11 + $0x90] sm:$0xff] }
  0x58   : > { %2449 = vmatpush3.bf16.msra.mxu0 %v1551_v5  ;;  %2436 = vmatprep.mubr.msk.bf16.mxu0 %vm597_vm4, %v1392_v17  ;;  %v3186_v35 = vsel %vm850_vm5, %v1380_v52, %v1381_v29  ;;  %v925_v5 = vpack.c.bf16 %v2186_v54, %v2186_v54  ;;  %v3192_v2 = vpack.c.bf16 %v3173_v9, %v3170_v56  ;;  %v885_v16 = vrot.slane %v3048_v15, 2  ;;  %v3211_v29 = vld [vmem:[%s2891_s11 + $0x120] sm:$0xff]  ;;  %v476_v15 = vld [vmem:[%s2891_s11 + $0x128] sm:$0x3] }
  0x59   : > { %v3195_v45 = vsel %vm850_vm5, %v878_v26, %v879_v24  ;;  %v887_v20 = vrot.slane %v3068_v36, 2  ;;  %v1393_v17 = vpack.c.bf16 %v3186_v35, %v3180_v30  ;;  %v3202_v46 = vsel %vm850_vm5, %v881_v61, %v882_v32 }
  0x5a   : > { %3577 = vst [vmem:[#allocation13_spill] sm:$0xff] %v3192_v2  ;;  %v951_v7 = vand.u32 %v925_v5, %v2909_v49  ;;  %v888_v52 = vrot.slane %v3071_v37, 2  ;;  %v480_v54 = vpack.c.bf16 %v2907_v48, %v2898_v42  ;;  %v1394_v24 = vpack.c.bf16 %v3202_v46, %v3195_v45 }
  0x5b   : > { %v3215_v26 = vsel %vm850_vm5, %v884_v40, %v885_v16  ;;  %v890_v61 = vrot.slane %v3090_v41, 2  ;;  %v891_v37 = vrot.slane %v3093_v43, 2  ;;  %v893_v5 = vrot.slane %v3117_v57, 2 }
  0x5c   : > { %2376 = vmatprep.subr.bf16.mxu1 %v951_v7  ;;  %v3219_v32 = vsel %vm850_vm5, %v887_v20, %v888_v52  ;;  %v894_v18 = vrot.slane %v3120_v63, 2  ;;  %v896_v40 = vrot.slane %v3132_v10, 2  ;;  %v897_v16 = vrot.slane %v3135_v22, 2  ;;  %v2195_v63 = vld [vmem:[%s3550_s1 + $0xc] sm:$0x7] }
  0x5d   : > { %v1383_v43 = vrot.slane %v3211_v29, 2  ;;  %v1384_v20 = vrot.slane %v476_v15, 2  ;;  %v1682_v52 = vpack.c.bf16 %v2231_v50, %v2231_v50  ;;  %v1395_v22 = vpack.c.bf16 %v3219_v32, %v3215_v26 }
  0x5e   : > { %2355 = vmatmul.mubr.msk.bf16.gmra.mrb[12].mxu1 %vm597_vm4, %v3192_v2  ;;  %v3243_v8 = vsel %vm850_vm5, %v890_v61, %v891_v37  ;;  %v3246_v2 = vsel %vm850_vm5, %v893_v5, %v894_v18  ;;  %v482_v61 = vpack.c.bf16 %v2959_v13, %v2935_v62  ;;  %v1670_v18 = vrot.slane %v3258_v34, 1 }
  0x5f   : > { %2437 = vmatmul.mubr.msk.bf16.gmra.mrb[4].mxu0 %vm597_vm4, %v1393_v17  ;;  %2360 = vmatprep.mubr.msk.bf16.mxu1 %vm597_vm4, %v480_v54  ;;  %v481_v17 = vpack.c.bf16 %v2926_v59, %v2916_v53  ;;  %3578 = vst [vmem:[#allocation14_spill] sm:$0xff] %v3243_v8  ;;  %3579 = vst [vmem:[#allocation15_spill] sm:$0xff] %v3246_v2  ;;  %v3249_v54 = vsel %vm850_vm5, %v896_v40, %v897_v16  ;;  %v3271_v40 = vld [vmem:[%s2891_s11 + $0x130] sm:$0xff]  ;;  %v875_v16 = vrot.slane %v2994_v33, 2  ;;  %vm1980_vm6 = vcmask 261120  }
  0x60   : > { %2440 = vmatprep.mubr.msk.bf16.mxu0 %vm597_vm4, %v1394_v24  ;;  %3580 = vst [vmem:[#allocation16_spill] sm:$0xff] %v3249_v54  ;;  %v3252_v24 = vsel %vm850_vm5, %v1383_v43, %v1384_v20  ;;  %v3255_v50 = vand.u32 %v1682_v52, %v2909_v49  ;;  %v1076_v59 = vpack.c.bf16 %v2195_v63, %v2195_v63  ;;  %v876_v43 = vrot.slane %v3002_v38, 2 }
  0x61   : > { %v1396_v37 = vpack.c.bf16 %v3246_v2, %v3243_v8  ;;  %v483_v20 = vpack.c.bf16 %v2979_v25, %v2962_v14  ;;  %v1397_v63 = vpack.c.bf16 %v3252_v24, %v3249_v54  ;;  %v1673_v52 = vrot.slane %v3271_v40, 1  ;;  %v478_v2 = vld [vmem:[%s2891_s11 + $0x138] sm:$0x3] }
  0x62   : > { %2466 = vmatprep.subr.bf16.mxu0 %v3255_v50  ;;  %v3268_v5 = vand.u32 %v1076_v59, %v2909_v49  ;;  %v1671_v62 = vrot.slane %v458_v4, 1  ;;  %v3284_v59 = vsel %vm850_vm5, %v875_v16, %v876_v43  ;;  %v1224_v55 = vrot.slane %v3211_v29, 1 }
  0x63   : > { %v1805_v54 = vrot.slane %v3258_v34, 2  ;;  %v1808_v8 = vrot.slane %v3271_v40, 2  ;;  %v1225_v16 = vrot.slane %v476_v15, 1  ;;  %v1674_v0 = vrot.slane %v478_v2, 1 }
  0x64   : > { %v1072_v38 = vpack.c.bf16 %v3033_v6, %v3012_v44  ;;  %v1235_v43 = vpack.c.bf16 %v3105_v12, %v3051_v21  ;;  %vm2025_vm7 = vcmask 1041409   ;;  %vm2029_vm8 = vcmask 254976  }
  0x65   : > { %v3306_v13 = vsel %vm521_vm3, %v1224_v55, %v1225_v16  ;;  %v484_v16 = vpack.c.bf16 %v3012_v44, %v2994_v33  ;;  %v3601_v44 = vld [vmem:[#allocation9_spill] sm:$0xff]  ;;  %vm2730_vm9 = vmmov (!%p2250_p10), 0  }
  0x66   : > { %2361 = vmatmul.mubr.msk.bf16.vlgmr.msra.gmra.mrb[0].mxu1 %vm597_vm4, %v481_v17  ;;  %v1238_v15 = vpack.c.bf16 %v3306_v13, %v3173_v9 }
  0x67   : > { %2441 = vmatmul.mubr.msk.bf16.gmra.mrb[8].mxu0 %vm597_vm4, %v1395_v22  ;;  %2377 = vmatpush3.bf16.msra.mxu1 %v951_v7  ;;  %v3295_v22 = vsel %vm521_vm3, %v1670_v18, %v1671_v62  ;;  %v1806_v7 = vrot.slane %v458_v4, 2  ;;  %v1809_v18 = vrot.slane %v478_v2, 2  ;;  %v2240_v4 = vld [vmem:[%s3550_s1 + $0x20] sm:$0x7] }
  0x68   : > { %2364 = vmatprep.mubr.msk.bf16.mxu1 %vm597_vm4, %v482_v61  ;;  %2444 = vmatprep.mubr.msk.bf16.mxu0 %vm597_vm4, %v1396_v37  ;;  %v3315_v37 = vsel %vm521_vm3, %v1673_v52, %v1674_v0  ;;  %v1817_v2 = vpack.c.bf16 %v2240_v4, %v2240_v4 }
  0x69   : > { %2394 = vmatprep.subr.bf16.mxu1 %v3268_v5  ;;  %v1681_v62 = vpack.c.bf16 %v3315_v37, %v3306_v13  ;;  %v3328_v0 = vsel %vm850_vm5, %v1805_v54, %v1806_v7  ;;  %v3336_v55 = vsel %vm850_vm5, %v1808_v8, %v1809_v18  ;;  %v485_v54 = vpack.c.bf16 %v3045_v11, %v3033_v6  ;;  %v3480_v13 = vld [vmem:[%s3551_s2] ss:$0 sm:$0xff] }
  0x6a   : > { %v1815_v52 = vpack.c.bf16 %v3328_v0, %v3186_v35  ;;  %v1816_v33 = vpack.c.bf16 %v3336_v55, %v3252_v24  ;;  %v486_v7 = vpack.c.bf16 %v3090_v41, %v3068_v36  ;;  %v851_v8 = vrot.slane %v2898_v42, 2 }
  0x6b   : > { %v852_v18 = vrot.slane %v2904_v47, 2  ;;  %v487_v42 = vpack.c.bf16 %v3132_v10, %v3117_v57  ;;  %v1541_v47 = vpack.c.bf16 %v3258_v34, %v2985_v27  ;;  %v3581_v34 = vld [vmem:[#allocation14_spill] sm:$0xff] }
  0x6e   : > { %2365 = vmatmul.mubr.msk.bf16.gmra.mrb[4].mxu1 %vm597_vm4, %v483_v20 }
  0x6f   : > { %2445 = vmatmul.mubr.msk.bf16.gmra.mrb[12].mxu0 %vm597_vm4, %v1397_v63  ;;  %2368 = vmatprep.mubr.msk.bf16.mxu1 %vm597_vm4, %v484_v16  ;;  %v1825_v63 = vand.u32 %v1817_v2, %v2909_v49  ;;  %v3592_v16 = vld [vmem:[#allocation12_spill] sm:$0xff] }
  0x70   : > { %2450 = vmatprep.mubr.msk.bf16.mxu0 %vm597_vm4, %v481_v17  ;;  %v853_v17 = vsel %vm850_vm5, %v851_v8, %v852_v18 }
  0x71   : > { %v917_v49 = vpack.c.bf16 %v3063_v31, %v853_v17  ;;  %v920_v31 = vpack.c.bf16 %v3180_v30, %v3154_v58  ;;  %v3582_v58 = vld [vmem:[#allocation7_spill] sm:$0xff]  ;;  %v3583_v30 = vld [vmem:[#allocation8_spill] sm:$0xff] }
  0x76   : > { %2369 = vmatmul.mubr.msk.bf16.gmra.mrb[8].mxu1 %vm597_vm4, %v485_v54 }
  0x77   : > { %2451 = vmatmul.mubr.msk.bf16.vlgmr.msra.gmra.mrb[0].mxu0 %vm597_vm4, %v482_v61  ;;  %2372 = vmatprep.mubr.msk.bf16.mxu1 %vm597_vm4, %v486_v7  ;;  %v919_v61 = vpack.c.bf16 %v3149_v19, %v3086_v1  ;;  %v922_v1 = vpack.c.bf16 %v3215_v26, %v3202_v46  ;;  %v923_v19 = vpack.c.bf16 %v3581_v34, %v3219_v32  ;;  %v3588_v32 = vld [vmem:[#allocation10_spill] sm:$0xff] }
  0x78   : > { %2467 = vmatpush3.bf16.msra.mxu0 %v3255_v50  ;;  %2454 = vmatprep.mubr.msk.bf16.mxu0 %vm597_vm4, %v483_v20  ;;  %v918_v50 = vpack.c.bf16 %v3081_v51, %v3076_v39  ;;  %v1542_v39 = vpack.c.bf16 %v3271_v40, %v3211_v29  ;;  %v921_v51 = vpack.c.bf16 %v3195_v45, %v3284_v59  ;;  %v3584_v45 = vld [vmem:[#allocation15_spill] sm:$0xff]  ;;  %v3589_v40 = vld [vmem:[#allocation5_spill] sm:$0xff]  ;;  %v3590_v20 = vld [vmem:[#allocation4_spill] sm:$0xff] }
  0x79   : > { %2484 = vmatprep.subr.bf16.mxu0 %v1825_v63  ;;  %v3586_v46 = vpack.c.bf16 %v3295_v22, %v3028_v3  ;;  %v3587_v26 = vpack.c.bf16 %v2916_v53, %v2907_v48  ;;  %v3591_v59 = vpack.c.bf16 %v3589_v40, %v3590_v20  ;;  %v3593_v3 = vld [vmem:[#allocation6_spill] sm:$0xff]  ;;  %v3595_v48 = vld [vmem:[#allocation13_spill] sm:$0xff]  ;;  %v3596_v53 = vpack.c.bf16 %v2985_v27, %v2979_v25  ;;  %v3600_v27 = vld [vmem:[#allocation11_spill] sm:$0xff] }
  0x7a   : > { %v3594_v22 = vpack.c.bf16 %v2962_v14, %v3593_v3  ;;  %v3598_v14 = vpack.c.bf16 %v3117_v57, %v3090_v41  ;;  %v3599_v25 = vpack.c.bf16 %v3211_v29, %v3132_v10  ;;  %v3602_v6 = vpack.c.bf16 %v3600_v27, %v3601_v44 }
  0x7e   : > { %2373 = vmatmul.mubr.msk.bf16.gmra.mrb[12].mxu1 %vm597_vm4, %v487_v42 }
  0x7f   : > { %2455 = vmatmul.mubr.msk.bf16.gmra.mrb[4].mxu0 %vm597_vm4, %v1541_v47  ;;  %2378 = vmatprep.mubr.msk.bf16.mxu1 %vm597_vm4, %v917_v49 }
  0x80   : > { %2458 = vmatprep.mubr.msk.bf16.mxu0 %vm597_vm4, %v485_v54 }
  0x86   : > { %2379 = vmatmul.mubr.msk.bf16.vlgmr.msra.gmra.mrb[0].mxu1 %vm597_vm4, %v918_v50 }
  0x87   : > { %2459 = vmatmul.mubr.msk.bf16.gmra.mrb[8].mxu0 %vm597_vm4, %v486_v7  ;;  %2395 = vmatpush3.bf16.msra.mxu1 %v3268_v5  ;;  %v3585_v5 = vld [vmem:[#allocation16_spill] sm:$0xff] }
  0x88   : > { %2382 = vmatprep.mubr.msk.bf16.mxu1 %vm597_vm4, %v919_v61  ;;  %2462 = vmatprep.mubr.msk.bf16.mxu0 %vm597_vm4, %v487_v42 }
  0x89   : > { %2510 = vmatprep.subr.bf16.mxu1 %v2929_v60 }
  0x8e   : > { %2383 = vmatmul.mubr.msk.bf16.gmra.mrb[4].mxu1 %vm597_vm4, %v920_v31 }
  0x8f   : > { %2463 = vmatmul.mubr.msk.bf16.gmra.mrb[12].mxu0 %vm597_vm4, %v1542_v39  ;;  %2386 = vmatprep.mubr.msk.bf16.mxu1 %vm597_vm4, %v921_v51 }
  0x90   : > { %2468 = vmatprep.mubr.msk.bf16.mxu0 %vm597_vm4, %v2987_v28  ;;  %v924_v28 = vpack.c.bf16 %v3585_v5, %v3584_v45 }
  0x96   : > { %2387 = vmatmul.mubr.msk.bf16.gmra.mrb[8].mxu1 %vm597_vm4, %v922_v1 }
  0x97   : > { %2469 = vmatmul.mubr.msk.bf16.vlgmr.msra.gmra.mrb[0].mxu0 %vm597_vm4, %v3582_v58  ;;  %2390 = vmatprep.mubr.msk.bf16.mxu1 %vm597_vm4, %v923_v19 }
  0x98   : > { %2485 = vmatpush3.bf16.msra.mxu0 %v1825_v63  ;;  %2472 = vmatprep.mubr.msk.bf16.mxu0 %vm597_vm4, %v3583_v30 }
  0x9e   : > { %2391 = vmatmul.mubr.msk.bf16.gmra.mrb[12].mxu1 %vm597_vm4, %v924_v28 }
  0x9f   : > { %2473 = vmatmul.mubr.msk.bf16.gmra.mrb[4].mxu0 %vm597_vm4, %v3586_v46  ;;  %2396 = vmatprep.mubr.msk.bf16.mxu1 %vm597_vm4, %v3587_v26 }
  0xa0   : > { %2476 = vmatprep.mubr.msk.bf16.mxu0 %vm597_vm4, %v3588_v32 }
  0xa6   : > { %2397 = vmatmul.mubr.msk.bf16.vlgmr.msra.gmra.mrb[0].mxu1 %vm597_vm4, %v3591_v59 }
  0xa7   : > { %2477 = vmatmul.mubr.msk.bf16.gmra.mrb[8].mxu0 %vm597_vm4, %v3592_v16  ;;  %2511 = vmatpush3.bf16.msra.mxu1 %v2929_v60  ;;  %v3597_v60 = vpack.c.bf16 %v3068_v36, %v3045_v11  ;;  %v3603_v11 = vpack.c.bf16 %v3170_v56, %v3138_v23 }
  0xa8   : > { %2400 = vmatprep.mubr.msk.bf16.mxu1 %vm597_vm4, %v3594_v22  ;;  %2480 = vmatprep.mubr.msk.bf16.mxu0 %vm597_vm4, %v3595_v48 }
  0xae   : > { %2401 = vmatmul.mubr.msk.bf16.gmra.mrb[4].mxu1 %vm597_vm4, %v3596_v53 }
  0xaf   : > { %2481 = vmatmul.mubr.msk.bf16.gmra.mrb[12].mxu0 %vm597_vm4, %v1681_v62  ;;  %2404 = vmatprep.mubr.msk.bf16.mxu1 %vm597_vm4, %v1072_v38 }
  0xb0   : > { %2486 = vmatprep.mubr.msk.bf16.mxu0 %vm597_vm4, %v918_v50 }
  0xb6   : > { %2405 = vmatmul.mubr.msk.bf16.gmra.mrb[8].mxu1 %vm597_vm4, %v3597_v60 }
  0xb7   : > { %2487 = vmatmul.mubr.msk.bf16.vlgmr.msra.gmra.mrb[0].mxu0 %vm597_vm4, %v919_v61  ;;  %2408 = vmatprep.mubr.msk.bf16.mxu1 %vm597_vm4, %v3598_v14 }
  0xb8   : > { %2490 = vmatprep.mubr.msk.bf16.mxu0 %vm597_vm4, %v920_v31 }
  0xbe   : > { %2409 = vmatmul.mubr.msk.bf16.gmra.mrb[12].mxu1 %vm597_vm4, %v3599_v25 }
  0xbf   : > { %2491 = vmatmul.mubr.msk.bf16.gmra.mrb[4].mxu0 %vm597_vm4, %v1815_v52  ;;  %2422 = vmatprep.mubr.msk.bf16.mxu1 %vm597_vm4, %v1235_v43 }
  0xc0   : > { %2494 = vmatprep.mubr.msk.bf16.mxu0 %vm597_vm4, %v922_v1 }
  0xc6   : > { %2423 = vmatmul.mubr.msk.bf16.vlgmr.msra.gmra.mrb[8].mxu1 %vm597_vm4, %v3602_v6 }
  0xc7   : > { %2495 = vmatmul.mubr.msk.bf16.gmra.mrb[8].mxu0 %vm597_vm4, %v923_v19  ;;  %2426 = vmatprep.mubr.msk.bf16.mxu1 %vm597_vm4, %v3603_v11 }
  0xc8   : > { %2498 = vmatprep.mubr.msk.bf16.mxu0 %vm597_vm4, %v924_v28 }
  0xce   : > { %2427 = vmatmul.mubr.msk.bf16.gmra.mrb[12].mxu1 %vm597_vm4, %v1238_v15 }
  0xcf   : > { %2499 = vmatmul.mubr.msk.bf16.gmra.mrb[12].mxu0 %vm597_vm4, %v1816_v33 }
 0x179   : > { %v2398_v21 = vpop.f32.mrb[0].mxu1 }
 0x17a   : > { %v1138_v36 = vpop.f32.mrb[1].mxu1 }
 0x17b   : > { %v2399_v41 = vpop.f32.mrb[2].mxu1 }
 0x17c   : > { %v1141_v12 = vpop.f32.mrb[3].mxu1 }
 0x181   : > { %v2402_v57 = vpop.f32.mrb[4].mxu1 }
 0x182   : > { %v1154_v10 = vpop.f32.mrb[5].mxu1 }
 0x183   : > { %v2403_v23 = vpop.f32.mrb[6].mxu1 }
 0x184   : > { %v1157_v56 = vpop.f32.mrb[7].mxu1 }
 0x18a   : > { %v2488_v35 = vpop.f32.mrb[0].mxu0 }
 0x18b   : > { %v2512_v29 = vadd.f32 %v2488_v35, %v2398_v21  ;;  %v1861_v9 = vpop.f32.mrb[1].mxu0 }
 0x18c   : > { %v2513_v38 = vadd.f32 %v1861_v9, %v1138_v36  ;;  %v2489_v24 = vpop.f32.mrb[2].mxu0 }
 0x18d   : > { %v2514_v43 = vadd.f32 %v2489_v24, %v2399_v41  ;;  %v1864_v62 = vpop.f32.mrb[3].mxu0  ;;  %v1949_v15 = vadd.f32 %v2512_v29, %v3480_v13 }
 0x18e   : > { %v1947_v37 = vadd.f32 %v2513_v38, %v3480_v13  ;;  %v2515_v55 = vadd.f32 %v1864_v62, %v1141_v12 }
 0x18f   : > { %v1950_v4 = vadd.f32 %v2514_v43, %v3480_v13  ;;  %v1965_v33 = vmax.f32 %v1949_v15, 0.0 }
 0x190   : > { %v1963_v0 = vmax.f32 %v1947_v37, 0.0  ;;  %v1948_v52 = vadd.f32 %v2515_v55, %v3480_v13 }
 0x191   : > { %v1966_v63 = vmax.f32 %v1950_v4, 0.0  ;;  %v1984_v31 = vsel %vm1980_vm6, %v1965_v33, 0.0 }
 0x192   : > { %v1964_v2 = vmax.f32 %v1948_v52, 0.0  ;;  %v2492_v54 = vpop.f32.mrb[4].mxu0  ;;  %v1981_v18 = vsel %vm1980_vm6, %v1963_v0, 0.0 }
 0x193   : > { %v2516_v7 = vadd.f32 %v2492_v54, %v2402_v57  ;;  %v1877_v8 = vpop.f32.mrb[5].mxu0  ;;  %v1986_v19 = vsel %vm1980_vm6, %v1966_v63, 0.0 }
 0x194   : > { %v1982_v17 = vsel %vm1980_vm6, %v1964_v2, 0.0  ;;  %v2517_v42 = vadd.f32 %v1877_v8, %v1154_v10  ;;  %v2493_v47 = vpop.f32.mrb[6].mxu0 }
 0x195   : > { %v1983_v49 = vadd.f32 %v1982_v17, %v1981_v18  ;;  %v2518_v50 = vadd.f32 %v2493_v47, %v2403_v23  ;;  %v1880_v61 = vpop.f32.mrb[7].mxu0  ;;  %v1953_v39 = vadd.f32 %v2516_v7, %v3480_v13 }
 0x196   : > { %v1951_v51 = vadd.f32 %v2517_v42, %v3480_v13  ;;  %v2519_v1 = vadd.f32 %v1880_v61, %v1157_v56 }
 0x197   : > { %v1985_v34 = vadd.f32 %v1984_v31, %v1983_v49  ;;  %v1954_v30 = vadd.f32 %v2518_v50, %v3480_v13  ;;  %v1969_v28 = vmax.f32 %v1953_v39, 0.0 }
 0x198   : > { %v1967_v58 = vmax.f32 %v1951_v51, 0.0  ;;  %v1952_v45 = vadd.f32 %v2519_v1, %v3480_v13 }
 0x199   : > { %v1987_v5 = vadd.f32 %v1986_v19, %v1985_v34  ;;  %v2424_v32 = vpop.f32.mrb[8].mxu1  ;;  %v1970_v22 = vmax.f32 %v1954_v30, 0.0  ;;  %v1992_v11 = vsel %vm1980_vm6, %v1969_v28, 0.0 }
 0x19a   : > { %v1988_v46 = vsel %vm1980_vm6, %v1967_v58, 0.0  ;;  %v1968_v26 = vmax.f32 %v1952_v45, 0.0  ;;  %v2496_v40 = vpop.f32.mrb[8].mxu0  ;;  %v1333_v16 = vpop.f32.mrb[9].mxu1 }
 0x19b   : > { %v1989_v20 = vadd.f32 %v1988_v46, %v1987_v5  ;;  %v2520_v59 = vadd.f32 %v2496_v40, %v2424_v32  ;;  %v1893_v3 = vpop.f32.mrb[9].mxu0  ;;  %v2425_v60 = vpop.f32.mrb[10].mxu1  ;;  %v1994_v57 = vsel %vm1980_vm6, %v1970_v22, 0.0 }
 0x19c   : > { %v1990_v48 = vsel %vm1980_vm6, %v1968_v26, 0.0  ;;  %v2521_v53 = vadd.f32 %v1893_v3, %v1333_v16  ;;  %v2497_v14 = vpop.f32.mrb[10].mxu0  ;;  %v1336_v44 = vpop.f32.mrb[11].mxu1 }
 0x19d   : > { %v1991_v25 = vadd.f32 %v1990_v48, %v1989_v20  ;;  %v2522_v27 = vadd.f32 %v2497_v14, %v2425_v60  ;;  %v1896_v6 = vpop.f32.mrb[11].mxu0  ;;  %v1957_v21 = vadd.f32 %v2520_v59, %v3480_v13  ;;  %v1979_v14 = vld [vmem:[#allocation2] sm:$0x3] }
 0x19e   : > { %v1955_v36 = vadd.f32 %v2521_v53, %v3480_v13  ;;  %v2523_v41 = vadd.f32 %v1896_v6, %v1336_v44  ;;  %v2037_v6 = vld [vmem:[%s3552_s3] sm:$0xff] (!%p2250_p10) }
 0x19f   : > { %v1993_v12 = vadd.f32 %v1992_v11, %v1991_v25  ;;  %v1958_v23 = vadd.f32 %v2522_v27, %v3480_v13  ;;  %v1973_v29 = vmax.f32 %v1957_v21, 0.0  ;;  %v2038_v11 = vld [vmem:[%s3552_s3 + $0x8] sm:$0xff] (!%p2250_p10)  ;;  %v2039_v21 = vld [vmem:[%s3552_s3 + $0x10] sm:$0xff] (!%p2250_p10) }
 0x1a0   : > { %v1971_v10 = vmax.f32 %v1955_v36, 0.0  ;;  %v1956_v56 = vadd.f32 %v2523_v41, %v3480_v13  ;;  %v2729_v36 = vmov (!%p2250_p10), 0.0   ;;  %v2042_v41 = vpack.c.bf16 (!%p2250_p10), %v2038_v11, %v2037_v6 }
 0x1a1   : > { %v1995_v35 = vadd.f32 %v1994_v57, %v1993_v12  ;;  %v2428_v38 = vpop.f32.mrb[12].mxu1  ;;  %v1974_v55 = vmax.f32 %v1958_v23, 0.0  ;;  %v2005_v18 = vsel %vm1980_vm6, %v1973_v29, 0.0  ;;  %2502 = vmatprep.subr.bf16.mxu0 (!%p2250_p10), %v2729_v36  ;;  %v2040_v12 = vld [vmem:[%s3552_s3 + $0x18] sm:$0xff] (!%p2250_p10)  ;;  %2506 = vmatprep.mubr.msk.bf16.mxu0 (!%p2250_p10), %vm2730_vm9, %v2729_v36 }
 0x1a2   : > { %v1972_v9 = vmax.f32 %v1956_v56, 0.0  ;;  %v2500_v24 = vpop.f32.mrb[12].mxu0  ;;  %v1349_v62 = vpop.f32.mrb[13].mxu1  ;;  %v2002_v37 = vsel %vm1980_vm6, %v1971_v10, 0.0  ;;  %2503 = vmatpush3.bf16.msra.mxu0 (!%p2250_p10), %v2042_v41  ;;  %v2043_v23 = vpack.c.bf16 (!%p2250_p10), %v2040_v12, %v2039_v21 }
 0x1a3   : > { %v2524_v43 = vadd.f32 %v2500_v24, %v2428_v38  ;;  %v1909_v15 = vpop.f32.mrb[13].mxu0  ;;  %v2429_v52 = vpop.f32.mrb[14].mxu1  ;;  %v2007_v49 = vsel %vm1980_vm6, %v1974_v55, 0.0  ;;  %v1996_v39 = vrot.slane %v1995_v35, 4  ;;  %2504 = vmatprep.subr.bf16.mxu0 (!%p2250_p10), %v2729_v36 }
 0x1a4   : > { %v2003_v0 = vsel %vm1980_vm6, %v1972_v9, 0.0  ;;  %v2525_v4 = vadd.f32 %v1909_v15, %v1349_v62  ;;  %v2501_v33 = vpop.f32.mrb[14].mxu0  ;;  %v1352_v7 = vpop.f32.mrb[15].mxu1 }
 0x1a5   : > { %v2004_v2 = vadd.f32 %v2003_v0, %v2002_v37  ;;  %v2526_v54 = vadd.f32 %v2501_v33, %v2429_v52  ;;  %v1912_v8 = vpop.f32.mrb[15].mxu0  ;;  %v1961_v63 = vadd.f32 %v2524_v43, %v3480_v13  ;;  %v1997_v5 = vadd.f32 %v1996_v39, %v1995_v35  ;;  %v2251_v35 = vld [vmem:[%s3553_s4] ss:$0 sm:$0xff] (!%p2250_p10) }
 0x1a6   : > { %v1959_v17 = vadd.f32 %v2525_v4, %v3480_v13  ;;  %v2527_v42 = vadd.f32 %v1912_v8, %v1352_v7  ;;  %2505 = vmatpush3.bf16.msra.mxu0 (!%p2250_p10), %v2043_v23 }
 0x1a7   : > { %v2006_v47 = vadd.f32 %v2005_v18, %v2004_v2  ;;  %v1962_v61 = vadd.f32 %v2526_v54, %v3480_v13  ;;  %v1977_v1 = vmax.f32 %v1961_v63, 0.0  ;;  %v1998_v40 = vrot.slane %v1997_v5, 2 }
 0x1a8   : > { %v1975_v50 = vmax.f32 %v1959_v17, 0.0  ;;  %v1960_v31 = vadd.f32 %v2527_v42, %v3480_v13 }
 0x1a9   : > { %v2008_v51 = vadd.f32 %v2007_v49, %v2006_v47  ;;  %v1978_v30 = vmax.f32 %v1962_v61, 0.0  ;;  %v2013_v46 = vsel %vm1980_vm6, %v1977_v1, 0.0  ;;  %v1999_v59 = vadd.f32 %v1998_v40, %v1997_v5 }
 0x1aa   : > { %v2009_v34 = vsel %vm1980_vm6, %v1975_v50, 0.0  ;;  %v1976_v19 = vmax.f32 %v1960_v31, 0.0 }
 0x1ab   : > { %v2010_v58 = vadd.f32 %v2009_v34, %v2008_v51  ;;  %v2015_v32 = vsel %vm1980_vm6, %v1978_v30, 0.0  ;;  %v2000_v22 = vrot.slane %v1999_v59, 1 }
 0x1ac   : > { %v2011_v45 = vsel %vm1980_vm6, %v1976_v19, 0.0 }
 0x1ad   : > { %v2012_v28 = vadd.f32 %v2011_v45, %v2010_v58  ;;  %v2001_v60 = vadd.f32 %v2000_v22, %v1999_v59 }
 0x1af   : > { %v2014_v26 = vadd.f32 %v2013_v46, %v2012_v28 }
 0x1b1   : > { %v2016_v20 = vadd.f32 %v2015_v32, %v2014_v26 }
 0x1b3   : > { %v2017_v13 = vrot.slane %v2016_v20, 4 }
 0x1b5   : > { %v2018_v16 = vadd.f32 %v2017_v13, %v2016_v20 }
 0x1b7   : > { %v2019_v3 = vrot.slane %v2018_v16, 2 }
 0x1b9   : > { %v2020_v48 = vadd.f32 %v2019_v3, %v2018_v16 }
 0x1bb   : > { %v2021_v53 = vrot.slane %v2020_v48, 1 }
 0x1bc   : > { %2034 = sbr.rel (%p2250_p10) target bundleno = 677 (0x2a5), region = 86 }
 0x1bd   : > { %v2022_v25 = vadd.f32 %v2021_v53, %v2020_v48 }
 0x1bf   : > { %v2026_v27 = vsel %vm2025_vm7, %v2022_v25, %v2001_v60 }
 0x1c0   : > { %v2028_v44 = vadd.f32 %v2026_v27, %v1979_v14 }
 0x1c2   : > { %2030 = vst.msk [vmem:[#allocation2] sm:$0x3] %vm2029_vm8, %v2028_v44 }
 0x1c9   : > { %v2035_v57 = vld [vmem:[#allocation2] sm:$0x3] }
 0x1ca   : > { %v2036_v10 = vmul.f32 0.0052083335, %v2035_v57 }
 0x1cc   : > { %v2041_v56 = vpack.c.bf16 %v2036_v10, %v2036_v10 }
 0x1ce   : > { %2507 = vmatmul.mubr.msk.bf16.vlgmr.msra.gmra.mrb[0].mxu0 %vm1980_vm6, %v2041_v56 }
 0x2a1   : > { %v2088_v29 = vpop.f32.mrb[0].mxu0 }
 0x2a2   : > { %v2089_v9 = vadd.f32 %v2251_v35, %v2088_v29  ;;  %v2508_v38 = vpop.f32.mrb[1].mxu0 }
 0x2a3   : > { %v2091_v24 = vpop.f32.mrb[2].mxu0 }
 0x2a4   : > { %2094 = vst [vmem:[%s3554_s5] sm:$0x3] %v2089_v9  ;;  %v2509_v43 = vpop.f32.mrb[3].mxu0 }
 0x2a5 PF: > { %s15_s22 = sadd.s32 1, %s2725_s22   ;;  %s3604_s18 = smov %s2713_s19 }
 0x2a6   : > { %p12_p11 = scmp.ge.s32.totalorder %s15_s22, 5   ;;  %s3605_s19 = smov %s2796_s26 }
 0x2a7   : > { %s3606_s20 = smov %s2721_s21  ;;  %s3607_s21 = smov %s3609_s23 }
 0x2a8   :  { %14 = sbr.rel (!%p12_p11) target bundleno = 3 (0x3), region = 129 }

</bundles_post_ra>
